<compile_context>
chip_gen: v6e
topology: v6e:2x2x1
jax: 0.10.0
libtpu: 0.0.40
codegen_flags: <defaults>
</compile_context>

<pallas_src>
import numpy as np
from functools import partial

import jax
import jax.numpy as jnp
from jax.experimental import pallas as pl
from jax.experimental.pallas import tpu as pltpu


# ----------------------------------------------------------------------------
# Fused kernel: LSTM recurrence (unrolled) + sparsemax attention + Linear(2,1)
# ----------------------------------------------------------------------------
def fused_lstm_attn_kernel(x_ref, wih_ref, whh_ref, b_ref, h0_ref, c0_ref,
                           ssm_ref, prev_ref, attn_ref,
                           h_out_ref, c_out_ref, attn_out_ref):
    """
    x_ref    : (SEQ*Bp, IN)  time-major input, batch padded to Bp, flattened
    wih_ref  : (IN, 4H)      pre-transposed input weights
    whh_ref  : (H, 4H)       pre-transposed recurrent weights
    b_ref    : (1, 4H)       b_ih + b_hh
    h0_ref   : (Bp, H)       initial hidden state (batch-padded)
    c0_ref   : (Bp, H)       initial cell state   (batch-padded)
    ssm_ref  : (Bp, T)       sparsemax logits (strided SSM slice, batch-padded)
    prev_ref : (T, Bp, H)    prev_sequence (batch-padded)
    attn_ref : SMEM (3,)     [attn_w00, attn_w01, attn_bias]
    outputs  : h_T, c_T, attentioned -- each (Bp, H)
    """
    Bp, H = h0_ref.shape
    T = ssm_ref.shape[1]
    SEQ = x_ref.shape[0] // Bp

    # --- Hoisted input projection: one MXU matmul covers every time step. ---
    gates_x = (jnp.dot(x_ref[...], wih_ref[...],
                       preferred_element_type=jnp.float32)
               + b_ref[...])                                   # (SEQ*Bp, 4H)

    whh = whh_ref[...]
    h = h0_ref[...]
    c = c0_ref[...]

    # --- Unrolled recurrence (SEQ is small & static): only h @ W_hh per step.
    for t in range(SEQ):
        gx = gates_x[t * Bp:(t + 1) * Bp, :]    # static, sublane-aligned slice
        gates = gx + jnp.dot(h, whh, preferred_element_type=jnp.float32)
        i_g = jax.nn.sigmoid(gates[:, 0:H])
        f_g = jax.nn.sigmoid(gates[:, H:2 * H])
        g_g = jnp.tanh(gates[:, 2 * H:3 * H])
        o_g = jax.nn.sigmoid(gates[:, 3 * H:4 * H])
        c = f_g * c + i_g * g_g
        h = o_g * jnp.tanh(c)

    h_out_ref[...] = h
    c_out_ref[...] = c

    # --- Sort-free sparsemax over the SSM slice (dim=1), one broadcasted cmp.
    # Element i is in the support iff 1 + k_i * z_i > S_i, where
    # k_i = #{j : z_j >= z_i}, S_i = sum_{j : z_j >= z_i} z_j.
    z = ssm_ref[...]                                           # (Bp, T)
    ge = (z[:, None, :] >= z[:, :, None]).astype(jnp.float32)  # (Bp, T, T)
    k = jnp.sum(ge, axis=-1)                                   # (Bp, T)
    s = jnp.sum(ge * z[:, None, :], axis=-1)                   # (Bp, T)
    in_support = ((1.0 + k * z) > s).astype(jnp.float32)       # (Bp, T)
    K = jnp.sum(in_support, axis=-1, keepdims=True)            # (Bp, 1)
    Ssum = jnp.sum(in_support * z, axis=-1, keepdims=True)     # (Bp, 1)
    tau = (Ssum - 1.0) / K
    weights = jnp.maximum(z - tau, 0.0)                        # (Bp, T)

    # --- Beat-weighted sum: wv[b, d] = sum_t prev[t, b, d] * weights[b, t]
    wv = jnp.zeros((Bp, H), jnp.float32)
    for t in range(T):                                         # T is tiny/static
        wv = wv + prev_ref[t] * weights[:, t:t + 1]

    # --- Linear(2, 1) on hstack((weight_vec, last_h)): w0*wv + w1*h + bias
    attn_out_ref[...] = wv * attn_ref[0] + h * attn_ref[1] + attn_ref[2]


# ----------------------------------------------------------------------------
# Wrapper (glue in plain JAX, jitted so pads/slices fuse with the kernel call).
# ----------------------------------------------------------------------------
@partial(jax.jit, static_argnames=("base_lstm",))
def music_generator_forward(in_put, hidden, prev_sequence, batched_ssm, params,
                            base_lstm=False):
    SEQ, B, IN = in_put.shape
    H = hidden[0].shape[-1]
    T = prev_sequence.shape[0]

    Bp = max(8, -(-B // 8) * 8)          # pad batch to a full sublane tile
    pad_b = Bp - B

    h0 = jnp.pad(hidden[0][0], ((0, pad_b), (0, 0)))
    c0 = jnp.pad(hidden[1][0], ((0, pad_b), (0, 0)))
    x_flat = jnp.pad(in_put, ((0, 0), (0, pad_b), (0, 0))).reshape(SEQ * Bp, IN)

    # inds_across_pieces = range(beat_num, ssm.shape[0], ssm.shape[1]); pre-slice
    # once here (hoisted strided gather) instead of a separate dispatch later.
    # TODO(synk): could move this gather in-kernel via scalar-prefetch row ids.
    ssm_slice = batched_ssm[T::batched_ssm.shape[1], :T]       # (B, T)
    ssm_p = jnp.pad(ssm_slice, ((0, pad_b), (0, 0)))
    prev_p = jnp.pad(prev_sequence, ((0, 0), (0, pad_b), (0, 0)))

    vmem = pl.BlockSpec(memory_space=pltpu.MemorySpace.VMEM)
    smem = pl.BlockSpec(memory_space=pltpu.MemorySpace.SMEM)

    h_T, c_T, attn = pl.pallas_call(
        fused_lstm_attn_kernel,
        out_shape=(jax.ShapeDtypeStruct((Bp, H), jnp.float32),
                   jax.ShapeDtypeStruct((Bp, H), jnp.float32),
                   jax.ShapeDtypeStruct((Bp, H), jnp.float32)),
        in_specs=[vmem,   # x_flat
                  vmem,   # wih_t
                  vmem,   # whh_t
                  vmem,   # bias
                  vmem,   # h0
                  vmem,   # c0
                  vmem,   # ssm_slice
                  vmem,   # prev_sequence
                  smem],  # attn params [w00, w01, bias]
        out_specs=(vmem, vmem, vmem),
    )(x_flat, params["wih_t"], params["whh_t"], params["bias"],
      h0, c0, ssm_p, prev_p, params["attn_params"])

    new_hidden = (h_T[None, :B, :], c_T[None, :B, :])
    if base_lstm:
        return h_T[None, :B, :], new_hidden   # avg_output.transpose(0, 1)
    # attentioned.permute(2, 0, 1) -> (1, B, H); .double() is applied host-side.
    return attn[None, :B, :], new_hidden


# ----------------------------------------------------------------------------
# Pure-JAX reference (for correctness check).
# ----------------------------------------------------------------------------
def sparsemax_ref(z):
    T = z.shape[1]
    zs = jnp.sort(z, axis=1)[:, ::-1]
    k = jnp.arange(1, T + 1, dtype=z.dtype)
    cs = jnp.cumsum(zs, axis=1)
    cond = (1.0 + k * zs) > cs
    K = jnp.sum(cond, axis=1, keepdims=True).astype(jnp.int32)
    tau = (jnp.take_along_axis(cs, K - 1, axis=1) - 1.0) / K.astype(z.dtype)
    return jnp.maximum(z - tau, 0.0)


def forward_ref(in_put, hidden, prev_sequence, batched_ssm, params):
    wih, whh, bih, bhh = params["wih"], params["whh"], params["bih"], params["bhh"]
    aw, ab = params["attn_w"], params["attn_b"]
    H = whh.shape[1]
    h, c = hidden[0][0], hidden[1][0]

    def step(carry, xt):
        h, c = carry
        gates = xt @ wih.T + bih + h @ whh.T + bhh
        i = jax.nn.sigmoid(gates[:, :H])
        f = jax.nn.sigmoid(gates[:, H:2 * H])
        g = jnp.tanh(gates[:, 2 * H:3 * H])
        o = jax.nn.sigmoid(gates[:, 3 * H:])
        c = f * c + i * g
        h = o * jnp.tanh(c)
        return (h, c), h

    (h, c), _ = jax.lax.scan(step, (h, c), in_put)
    beat_num = prev_sequence.shape[0]
    ssm_slice = batched_ssm[beat_num::batched_ssm.shape[1], :beat_num]
    w = sparsemax_ref(ssm_slice)
    wv = jnp.einsum("tbh,bt->bh", prev_sequence, w)
    out = wv * aw[0, 0] + h * aw[0, 1] + ab[0]
    return out[None, :, :], (h[None], c[None])


# ----------------------------------------------------------------------------
if __name__ == "__main__":
    B, SEQ, IN, H = 2, 8, 32, 128        # batch, seq_len, output_size, hidden_size
    BEATS, MAXLEN = 4, 16                # prev_sequence beats, SSM piece length

    key = jax.random.PRNGKey(0)
    ks = jax.random.split(key, 10)
    f32 = jnp.float32

    # Deterministic parameter init (PyTorch-style uniform bounds).
    s = 1.0 / np.sqrt(H)
    wih = jax.random.uniform(ks[0], (4 * H, IN), f32, -s, s)
    whh = jax.random.uniform(ks[1], (4 * H, H), f32, -s, s)
    bih = jax.random.uniform(ks[2], (4 * H,), f32, -s, s)
    bhh = jax.random.uniform(ks[3], (4 * H,), f32, -s, s)
    sa = 1.0 / np.sqrt(2.0)
    attn_w = jax.random.uniform(ks[4], (1, 2), f32, -sa, sa)
    attn_b = jax.random.uniform(ks[5], (1,), f32, -sa, sa)

    params = dict(
        wih=wih, whh=whh, bih=bih, bhh=bhh, attn_w=attn_w, attn_b=attn_b,
        wih_t=wih.T, whh_t=whh.T, bias=(bih + bhh).reshape(1, 4 * H),
        attn_params=jnp.array([attn_w[0, 0], attn_w[0, 1], attn_b[0]], f32),
    )

    # Inputs.
    in_put = jax.random.normal(ks[6], (SEQ, B, IN), f32)
    prev_sequence = jax.random.normal(ks[7], (BEATS, B, H), f32)
    batched_ssm = jax.random.normal(ks[8], (B * MAXLEN, MAXLEN), f32)

    # init_hidden(batch_size): zeros.
    h0 = jnp.zeros((1, B, H), f32)
    hidden = (h0, h0)

    attn_out, (h_T, c_T) = music_generator_forward(
        in_put, hidden, prev_sequence, batched_ssm, params)
    jax.block_until_ready((attn_out, h_T, c_T))

    # Correctness check against pure-JAX reference (all f32 on device).
    attn_ref, (h_ref, c_ref) = forward_ref(
        in_put, hidden, prev_sequence, batched_ssm, params)
    np.testing.assert_allclose(np.asarray(attn_out), np.asarray(attn_ref),
                               rtol=1e-4, atol=1e-4)
    np.testing.assert_allclose(np.asarray(h_T), np.asarray(h_ref),
                               rtol=1e-4, atol=1e-4)
    np.testing.assert_allclose(np.asarray(c_T), np.asarray(c_ref),
                               rtol=1e-4, atol=1e-4)

    # PyTorch forward returns .double(): emulate with a host-side cast so the
    # TPU path stays float32 (f64 is software-emulated on TPU).
    attn_out_double = np.asarray(attn_out).astype(np.float64)

    assert attn_out.shape == (1, B, H) and attn_out.dtype == jnp.float32
    assert attn_out_double.dtype == np.float64
    assert h_T.shape == (1, B, H) and c_T.shape == (1, B, H)

    print("KERNEL_OK")
</pallas_src>

<mosaic_0001>
module attributes {stable_mosaic.version = 11 : i64} {
  func.func @fused_lstm_attn_kernel(%arg0: memref<64x32xf32, #tpu.memory_space<vmem>>, %arg1: memref<32x512xf32, #tpu.memory_space<vmem>>, %arg2: memref<128x512xf32, #tpu.memory_space<vmem>>, %arg3: memref<1x512xf32, #tpu.memory_space<vmem>>, %arg4: memref<8x128xf32, #tpu.memory_space<vmem>>, %arg5: memref<8x128xf32, #tpu.memory_space<vmem>>, %arg6: memref<8x4xf32, #tpu.memory_space<vmem>>, %arg7: memref<4x8x128xf32, #tpu.memory_space<vmem>>, %arg8: memref<3xf32, #tpu.memory_space<smem>>, %arg9: memref<8x128xf32, #tpu.memory_space<vmem>>, %arg10: memref<8x128xf32, #tpu.memory_space<vmem>>, %arg11: memref<8x128xf32, #tpu.memory_space<vmem>>) attributes {dimension_semantics = [], scalar_prefetch = 0 : i64, scratch_operands = 0 : i64, tpu.core_type = #tpu.core_type<tc>} {
    %c0 = arith.constant 0 : index
    %c0_0 = arith.constant 0 : index
    %0 = vector.load %arg0[%c0, %c0_0] : memref<64x32xf32, #tpu.memory_space<vmem>>, vector<64x32xf32>
    %c0_1 = arith.constant 0 : index
    %c0_2 = arith.constant 0 : index
    %1 = vector.load %arg1[%c0_1, %c0_2] : memref<32x512xf32, #tpu.memory_space<vmem>>, vector<32x512xf32>
    %cst = arith.constant dense<0.000000e+00> : vector<64x512xf32>
    %2 = tpu.matmul %0, %1, %cst {dimension_numbers = #tpu.dot_dimension_numbers<[1], [0], [0], [1], [0, 0, 1, 1], [], []>} : vector<64x32xf32>, vector<32x512xf32>, vector<64x512xf32> -> vector<64x512xf32>
    %c0_3 = arith.constant 0 : index
    %c0_4 = arith.constant 0 : index
    %3 = vector.load %arg3[%c0_3, %c0_4] : memref<1x512xf32, #tpu.memory_space<vmem>>, vector<1x512xf32>
    %4 = vector.broadcast %3 : vector<1x512xf32> to vector<64x512xf32>
    %5 = arith.addf %2, %4 : vector<64x512xf32>
    %c0_5 = arith.constant 0 : index
    %c0_6 = arith.constant 0 : index
    %6 = vector.load %arg2[%c0_5, %c0_6] : memref<128x512xf32, #tpu.memory_space<vmem>>, vector<128x512xf32>
    %c0_7 = arith.constant 0 : index
    %c0_8 = arith.constant 0 : index
    %7 = vector.load %arg4[%c0_7, %c0_8] : memref<8x128xf32, #tpu.memory_space<vmem>>, vector<8x128xf32>
    %c0_9 = arith.constant 0 : index
    %c0_10 = arith.constant 0 : index
    %8 = vector.load %arg5[%c0_9, %c0_10] : memref<8x128xf32, #tpu.memory_space<vmem>>, vector<8x128xf32>
    %9 = vector.extract_strided_slice %5 {offsets = [0, 0], sizes = [8, 512], strides = [1, 1]} : vector<64x512xf32> to vector<8x512xf32>
    %cst_11 = arith.constant dense<0.000000e+00> : vector<8x512xf32>
    %10 = tpu.matmul %7, %6, %cst_11 {dimension_numbers = #tpu.dot_dimension_numbers<[1], [0], [0], [1], [0, 0, 1, 1], [], []>} : vector<8x128xf32>, vector<128x512xf32>, vector<8x512xf32> -> vector<8x512xf32>
    %11 = arith.addf %9, %10 : vector<8x512xf32>
    %12 = vector.extract_strided_slice %11 {offsets = [0, 0], sizes = [8, 128], strides = [1, 1]} : vector<8x512xf32> to vector<8x128xf32>
    %13 = arith.negf %12 : vector<8x128xf32>
    %14 = math.exp %13 : vector<8x128xf32>
    %cst_12 = arith.constant 1.000000e+00 : f32
    %15 = vector.broadcast %cst_12 : f32 to vector<8x128xf32>
    %16 = arith.addf %15, %14 : vector<8x128xf32>
    %17 = arith.divf %15, %16 : vector<8x128xf32>
    %18 = vector.extract_strided_slice %11 {offsets = [0, 128], sizes = [8, 128], strides = [1, 1]} : vector<8x512xf32> to vector<8x128xf32>
    %19 = arith.negf %18 : vector<8x128xf32>
    %20 = math.exp %19 : vector<8x128xf32>
    %cst_13 = arith.constant 1.000000e+00 : f32
    %21 = vector.broadcast %cst_13 : f32 to vector<8x128xf32>
    %22 = arith.addf %21, %20 : vector<8x128xf32>
    %23 = arith.divf %21, %22 : vector<8x128xf32>
    %24 = vector.extract_strided_slice %11 {offsets = [0, 256], sizes = [8, 128], strides = [1, 1]} : vector<8x512xf32> to vector<8x128xf32>
    %25 = math.tanh %24 : vector<8x128xf32>
    %26 = vector.extract_strided_slice %11 {offsets = [0, 384], sizes = [8, 128], strides = [1, 1]} : vector<8x512xf32> to vector<8x128xf32>
    %27 = arith.negf %26 : vector<8x128xf32>
    %28 = math.exp %27 : vector<8x128xf32>
    %cst_14 = arith.constant 1.000000e+00 : f32
    %29 = vector.broadcast %cst_14 : f32 to vector<8x128xf32>
    %30 = arith.addf %29, %28 : vector<8x128xf32>
    %31 = arith.divf %29, %30 : vector<8x128xf32>
    %32 = arith.mulf %23, %8 : vector<8x128xf32>
    %33 = arith.mulf %17, %25 : vector<8x128xf32>
    %34 = arith.addf %32, %33 : vector<8x128xf32>
    %35 = math.tanh %34 : vector<8x128xf32>
    %36 = arith.mulf %31, %35 : vector<8x128xf32>
    %37 = vector.extract_strided_slice %5 {offsets = [8, 0], sizes = [8, 512], strides = [1, 1]} : vector<64x512xf32> to vector<8x512xf32>
    %cst_15 = arith.constant dense<0.000000e+00> : vector<8x512xf32>
    %38 = tpu.matmul %36, %6, %cst_15 {dimension_numbers = #tpu.dot_dimension_numbers<[1], [0], [0], [1], [0, 0, 1, 1], [], []>} : vector<8x128xf32>, vector<128x512xf32>, vector<8x512xf32> -> vector<8x512xf32>
    %39 = arith.addf %37, %38 : vector<8x512xf32>
    %40 = vector.extract_strided_slice %39 {offsets = [0, 0], sizes = [8, 128], strides = [1, 1]} : vector<8x512xf32> to vector<8x128xf32>
    %41 = arith.negf %40 : vector<8x128xf32>
    %42 = math.exp %41 : vector<8x128xf32>
    %cst_16 = arith.constant 1.000000e+00 : f32
    %43 = vector.broadcast %cst_16 : f32 to vector<8x128xf32>
    %44 = arith.addf %43, %42 : vector<8x128xf32>
    %45 = arith.divf %43, %44 : vector<8x128xf32>
    %46 = vector.extract_strided_slice %39 {offsets = [0, 128], sizes = [8, 128], strides = [1, 1]} : vector<8x512xf32> to vector<8x128xf32>
    %47 = arith.negf %46 : vector<8x128xf32>
    %48 = math.exp %47 : vector<8x128xf32>
    %cst_17 = arith.constant 1.000000e+00 : f32
    %49 = vector.broadcast %cst_17 : f32 to vector<8x128xf32>
    %50 = arith.addf %49, %48 : vector<8x128xf32>
    %51 = arith.divf %49, %50 : vector<8x128xf32>
    %52 = vector.extract_strided_slice %39 {offsets = [0, 256], sizes = [8, 128], strides = [1, 1]} : vector<8x512xf32> to vector<8x128xf32>
    %53 = math.tanh %52 : vector<8x128xf32>
    %54 = vector.extract_strided_slice %39 {offsets = [0, 384], sizes = [8, 128], strides = [1, 1]} : vector<8x512xf32> to vector<8x128xf32>
    %55 = arith.negf %54 : vector<8x128xf32>
    %56 = math.exp %55 : vector<8x128xf32>
    %cst_18 = arith.constant 1.000000e+00 : f32
    %57 = vector.broadcast %cst_18 : f32 to vector<8x128xf32>
    %58 = arith.addf %57, %56 : vector<8x128xf32>
    %59 = arith.divf %57, %58 : vector<8x128xf32>
    %60 = arith.mulf %51, %34 : vector<8x128xf32>
    %61 = arith.mulf %45, %53 : vector<8x128xf32>
    %62 = arith.addf %60, %61 : vector<8x128xf32>
    %63 = math.tanh %62 : vector<8x128xf32>
    %64 = arith.mulf %59, %63 : vector<8x128xf32>
    %65 = vector.extract_strided_slice %5 {offsets = [16, 0], sizes = [8, 512], strides = [1, 1]} : vector<64x512xf32> to vector<8x512xf32>
    %cst_19 = arith.constant dense<0.000000e+00> : vector<8x512xf32>
    %66 = tpu.matmul %64, %6, %cst_19 {dimension_numbers = #tpu.dot_dimension_numbers<[1], [0], [0], [1], [0, 0, 1, 1], [], []>} : vector<8x128xf32>, vector<128x512xf32>, vector<8x512xf32> -> vector<8x512xf32>
    %67 = arith.addf %65, %66 : vector<8x512xf32>
    %68 = vector.extract_strided_slice %67 {offsets = [0, 0], sizes = [8, 128], strides = [1, 1]} : vector<8x512xf32> to vector<8x128xf32>
    %69 = arith.negf %68 : vector<8x128xf32>
    %70 = math.exp %69 : vector<8x128xf32>
    %cst_20 = arith.constant 1.000000e+00 : f32
    %71 = vector.broadcast %cst_20 : f32 to vector<8x128xf32>
    %72 = arith.addf %71, %70 : vector<8x128xf32>
    %73 = arith.divf %71, %72 : vector<8x128xf32>
    %74 = vector.extract_strided_slice %67 {offsets = [0, 128], sizes = [8, 128], strides = [1, 1]} : vector<8x512xf32> to vector<8x128xf32>
    %75 = arith.negf %74 : vector<8x128xf32>
    %76 = math.exp %75 : vector<8x128xf32>
    %cst_21 = arith.constant 1.000000e+00 : f32
    %77 = vector.broadcast %cst_21 : f32 to vector<8x128xf32>
    %78 = arith.addf %77, %76 : vector<8x128xf32>
    %79 = arith.divf %77, %78 : vector<8x128xf32>
    %80 = vector.extract_strided_slice %67 {offsets = [0, 256], sizes = [8, 128], strides = [1, 1]} : vector<8x512xf32> to vector<8x128xf32>
    %81 = math.tanh %80 : vector<8x128xf32>
    %82 = vector.extract_strided_slice %67 {offsets = [0, 384], sizes = [8, 128], strides = [1, 1]} : vector<8x512xf32> to vector<8x128xf32>
    %83 = arith.negf %82 : vector<8x128xf32>
    %84 = math.exp %83 : vector<8x128xf32>
    %cst_22 = arith.constant 1.000000e+00 : f32
    %85 = vector.broadcast %cst_22 : f32 to vector<8x128xf32>
    %86 = arith.addf %85, %84 : vector<8x128xf32>
    %87 = arith.divf %85, %86 : vector<8x128xf32>
    %88 = arith.mulf %79, %62 : vector<8x128xf32>
    %89 = arith.mulf %73, %81 : vector<8x128xf32>
    %90 = arith.addf %88, %89 : vector<8x128xf32>
    %91 = math.tanh %90 : vector<8x128xf32>
    %92 = arith.mulf %87, %91 : vector<8x128xf32>
    %93 = vector.extract_strided_slice %5 {offsets = [24, 0], sizes = [8, 512], strides = [1, 1]} : vector<64x512xf32> to vector<8x512xf32>
    %cst_23 = arith.constant dense<0.000000e+00> : vector<8x512xf32>
    %94 = tpu.matmul %92, %6, %cst_23 {dimension_numbers = #tpu.dot_dimension_numbers<[1], [0], [0], [1], [0, 0, 1, 1], [], []>} : vector<8x128xf32>, vector<128x512xf32>, vector<8x512xf32> -> vector<8x512xf32>
    %95 = arith.addf %93, %94 : vector<8x512xf32>
    %96 = vector.extract_strided_slice %95 {offsets = [0, 0], sizes = [8, 128], strides = [1, 1]} : vector<8x512xf32> to vector<8x128xf32>
    %97 = arith.negf %96 : vector<8x128xf32>
    %98 = math.exp %97 : vector<8x128xf32>
    %cst_24 = arith.constant 1.000000e+00 : f32
    %99 = vector.broadcast %cst_24 : f32 to vector<8x128xf32>
    %100 = arith.addf %99, %98 : vector<8x128xf32>
    %101 = arith.divf %99, %100 : vector<8x128xf32>
    %102 = vector.extract_strided_slice %95 {offsets = [0, 128], sizes = [8, 128], strides = [1, 1]} : vector<8x512xf32> to vector<8x128xf32>
    %103 = arith.negf %102 : vector<8x128xf32>
    %104 = math.exp %103 : vector<8x128xf32>
    %cst_25 = arith.constant 1.000000e+00 : f32
    %105 = vector.broadcast %cst_25 : f32 to vector<8x128xf32>
    %106 = arith.addf %105, %104 : vector<8x128xf32>
    %107 = arith.divf %105, %106 : vector<8x128xf32>
    %108 = vector.extract_strided_slice %95 {offsets = [0, 256], sizes = [8, 128], strides = [1, 1]} : vector<8x512xf32> to vector<8x128xf32>
    %109 = math.tanh %108 : vector<8x128xf32>
    %110 = vector.extract_strided_slice %95 {offsets = [0, 384], sizes = [8, 128], strides = [1, 1]} : vector<8x512xf32> to vector<8x128xf32>
    %111 = arith.negf %110 : vector<8x128xf32>
    %112 = math.exp %111 : vector<8x128xf32>
    %cst_26 = arith.constant 1.000000e+00 : f32
    %113 = vector.broadcast %cst_26 : f32 to vector<8x128xf32>
    %114 = arith.addf %113, %112 : vector<8x128xf32>
    %115 = arith.divf %113, %114 : vector<8x128xf32>
    %116 = arith.mulf %107, %90 : vector<8x128xf32>
    %117 = arith.mulf %101, %109 : vector<8x128xf32>
    %118 = arith.addf %116, %117 : vector<8x128xf32>
    %119 = math.tanh %118 : vector<8x128xf32>
    %120 = arith.mulf %115, %119 : vector<8x128xf32>
    %121 = vector.extract_strided_slice %5 {offsets = [32, 0], sizes = [8, 512], strides = [1, 1]} : vector<64x512xf32> to vector<8x512xf32>
    %cst_27 = arith.constant dense<0.000000e+00> : vector<8x512xf32>
    %122 = tpu.matmul %120, %6, %cst_27 {dimension_numbers = #tpu.dot_dimension_numbers<[1], [0], [0], [1], [0, 0, 1, 1], [], []>} : vector<8x128xf32>, vector<128x512xf32>, vector<8x512xf32> -> vector<8x512xf32>
    %123 = arith.addf %121, %122 : vector<8x512xf32>
    %124 = vector.extract_strided_slice %123 {offsets = [0, 0], sizes = [8, 128], strides = [1, 1]} : vector<8x512xf32> to vector<8x128xf32>
    %125 = arith.negf %124 : vector<8x128xf32>
    %126 = math.exp %125 : vector<8x128xf32>
    %cst_28 = arith.constant 1.000000e+00 : f32
    %127 = vector.broadcast %cst_28 : f32 to vector<8x128xf32>
    %128 = arith.addf %127, %126 : vector<8x128xf32>
    %129 = arith.divf %127, %128 : vector<8x128xf32>
    %130 = vector.extract_strided_slice %123 {offsets = [0, 128], sizes = [8, 128], strides = [1, 1]} : vector<8x512xf32> to vector<8x128xf32>
    %131 = arith.negf %130 : vector<8x128xf32>
    %132 = math.exp %131 : vector<8x128xf32>
    %cst_29 = arith.constant 1.000000e+00 : f32
    %133 = vector.broadcast %cst_29 : f32 to vector<8x128xf32>
    %134 = arith.addf %133, %132 : vector<8x128xf32>
    %135 = arith.divf %133, %134 : vector<8x128xf32>
    %136 = vector.extract_strided_slice %123 {offsets = [0, 256], sizes = [8, 128], strides = [1, 1]} : vector<8x512xf32> to vector<8x128xf32>
    %137 = math.tanh %136 : vector<8x128xf32>
    %138 = vector.extract_strided_slice %123 {offsets = [0, 384], sizes = [8, 128], strides = [1, 1]} : vector<8x512xf32> to vector<8x128xf32>
    %139 = arith.negf %138 : vector<8x128xf32>
    %140 = math.exp %139 : vector<8x128xf32>
    %cst_30 = arith.constant 1.000000e+00 : f32
    %141 = vector.broadcast %cst_30 : f32 to vector<8x128xf32>
    %142 = arith.addf %141, %140 : vector<8x128xf32>
    %143 = arith.divf %141, %142 : vector<8x128xf32>
    %144 = arith.mulf %135, %118 : vector<8x128xf32>
    %145 = arith.mulf %129, %137 : vector<8x128xf32>
    %146 = arith.addf %144, %145 : vector<8x128xf32>
    %147 = math.tanh %146 : vector<8x128xf32>
    %148 = arith.mulf %143, %147 : vector<8x128xf32>
    %149 = vector.extract_strided_slice %5 {offsets = [40, 0], sizes = [8, 512], strides = [1, 1]} : vector<64x512xf32> to vector<8x512xf32>
    %cst_31 = arith.constant dense<0.000000e+00> : vector<8x512xf32>
    %150 = tpu.matmul %148, %6, %cst_31 {dimension_numbers = #tpu.dot_dimension_numbers<[1], [0], [0], [1], [0, 0, 1, 1], [], []>} : vector<8x128xf32>, vector<128x512xf32>, vector<8x512xf32> -> vector<8x512xf32>
    %151 = arith.addf %149, %150 : vector<8x512xf32>
    %152 = vector.extract_strided_slice %151 {offsets = [0, 0], sizes = [8, 128], strides = [1, 1]} : vector<8x512xf32> to vector<8x128xf32>
    %153 = arith.negf %152 : vector<8x128xf32>
    %154 = math.exp %153 : vector<8x128xf32>
    %cst_32 = arith.constant 1.000000e+00 : f32
    %155 = vector.broadcast %cst_32 : f32 to vector<8x128xf32>
    %156 = arith.addf %155, %154 : vector<8x128xf32>
    %157 = arith.divf %155, %156 : vector<8x128xf32>
    %158 = vector.extract_strided_slice %151 {offsets = [0, 128], sizes = [8, 128], strides = [1, 1]} : vector<8x512xf32> to vector<8x128xf32>
    %159 = arith.negf %158 : vector<8x128xf32>
    %160 = math.exp %159 : vector<8x128xf32>
    %cst_33 = arith.constant 1.000000e+00 : f32
    %161 = vector.broadcast %cst_33 : f32 to vector<8x128xf32>
    %162 = arith.addf %161, %160 : vector<8x128xf32>
    %163 = arith.divf %161, %162 : vector<8x128xf32>
    %164 = vector.extract_strided_slice %151 {offsets = [0, 256], sizes = [8, 128], strides = [1, 1]} : vector<8x512xf32> to vector<8x128xf32>
    %165 = math.tanh %164 : vector<8x128xf32>
    %166 = vector.extract_strided_slice %151 {offsets = [0, 384], sizes = [8, 128], strides = [1, 1]} : vector<8x512xf32> to vector<8x128xf32>
    %167 = arith.negf %166 : vector<8x128xf32>
    %168 = math.exp %167 : vector<8x128xf32>
    %cst_34 = arith.constant 1.000000e+00 : f32
    %169 = vector.broadcast %cst_34 : f32 to vector<8x128xf32>
    %170 = arith.addf %169, %168 : vector<8x128xf32>
    %171 = arith.divf %169, %170 : vector<8x128xf32>
    %172 = arith.mulf %163, %146 : vector<8x128xf32>
    %173 = arith.mulf %157, %165 : vector<8x128xf32>
    %174 = arith.addf %172, %173 : vector<8x128xf32>
    %175 = math.tanh %174 : vector<8x128xf32>
    %176 = arith.mulf %171, %175 : vector<8x128xf32>
    %177 = vector.extract_strided_slice %5 {offsets = [48, 0], sizes = [8, 512], strides = [1, 1]} : vector<64x512xf32> to vector<8x512xf32>
    %cst_35 = arith.constant dense<0.000000e+00> : vector<8x512xf32>
    %178 = tpu.matmul %176, %6, %cst_35 {dimension_numbers = #tpu.dot_dimension_numbers<[1], [0], [0], [1], [0, 0, 1, 1], [], []>} : vector<8x128xf32>, vector<128x512xf32>, vector<8x512xf32> -> vector<8x512xf32>
    %179 = arith.addf %177, %178 : vector<8x512xf32>
    %180 = vector.extract_strided_slice %179 {offsets = [0, 0], sizes = [8, 128], strides = [1, 1]} : vector<8x512xf32> to vector<8x128xf32>
    %181 = arith.negf %180 : vector<8x128xf32>
    %182 = math.exp %181 : vector<8x128xf32>
    %cst_36 = arith.constant 1.000000e+00 : f32
    %183 = vector.broadcast %cst_36 : f32 to vector<8x128xf32>
    %184 = arith.addf %183, %182 : vector<8x128xf32>
    %185 = arith.divf %183, %184 : vector<8x128xf32>
    %186 = vector.extract_strided_slice %179 {offsets = [0, 128], sizes = [8, 128], strides = [1, 1]} : vector<8x512xf32> to vector<8x128xf32>
    %187 = arith.negf %186 : vector<8x128xf32>
    %188 = math.exp %187 : vector<8x128xf32>
    %cst_37 = arith.constant 1.000000e+00 : f32
    %189 = vector.broadcast %cst_37 : f32 to vector<8x128xf32>
    %190 = arith.addf %189, %188 : vector<8x128xf32>
    %191 = arith.divf %189, %190 : vector<8x128xf32>
    %192 = vector.extract_strided_slice %179 {offsets = [0, 256], sizes = [8, 128], strides = [1, 1]} : vector<8x512xf32> to vector<8x128xf32>
    %193 = math.tanh %192 : vector<8x128xf32>
    %194 = vector.extract_strided_slice %179 {offsets = [0, 384], sizes = [8, 128], strides = [1, 1]} : vector<8x512xf32> to vector<8x128xf32>
    %195 = arith.negf %194 : vector<8x128xf32>
    %196 = math.exp %195 : vector<8x128xf32>
    %cst_38 = arith.constant 1.000000e+00 : f32
    %197 = vector.broadcast %cst_38 : f32 to vector<8x128xf32>
    %198 = arith.addf %197, %196 : vector<8x128xf32>
    %199 = arith.divf %197, %198 : vector<8x128xf32>
    %200 = arith.mulf %191, %174 : vector<8x128xf32>
    %201 = arith.mulf %185, %193 : vector<8x128xf32>
    %202 = arith.addf %200, %201 : vector<8x128xf32>
    %203 = math.tanh %202 : vector<8x128xf32>
    %204 = arith.mulf %199, %203 : vector<8x128xf32>
    %205 = vector.extract_strided_slice %5 {offsets = [56, 0], sizes = [8, 512], strides = [1, 1]} : vector<64x512xf32> to vector<8x512xf32>
    %cst_39 = arith.constant dense<0.000000e+00> : vector<8x512xf32>
    %206 = tpu.matmul %204, %6, %cst_39 {dimension_numbers = #tpu.dot_dimension_numbers<[1], [0], [0], [1], [0, 0, 1, 1], [], []>} : vector<8x128xf32>, vector<128x512xf32>, vector<8x512xf32> -> vector<8x512xf32>
    %207 = arith.addf %205, %206 : vector<8x512xf32>
    %208 = vector.extract_strided_slice %207 {offsets = [0, 0], sizes = [8, 128], strides = [1, 1]} : vector<8x512xf32> to vector<8x128xf32>
    %209 = arith.negf %208 : vector<8x128xf32>
    %210 = math.exp %209 : vector<8x128xf32>
    %cst_40 = arith.constant 1.000000e+00 : f32
    %211 = vector.broadcast %cst_40 : f32 to vector<8x128xf32>
    %212 = arith.addf %211, %210 : vector<8x128xf32>
    %213 = arith.divf %211, %212 : vector<8x128xf32>
    %214 = vector.extract_strided_slice %207 {offsets = [0, 128], sizes = [8, 128], strides = [1, 1]} : vector<8x512xf32> to vector<8x128xf32>
    %215 = arith.negf %214 : vector<8x128xf32>
    %216 = math.exp %215 : vector<8x128xf32>
    %cst_41 = arith.constant 1.000000e+00 : f32
    %217 = vector.broadcast %cst_41 : f32 to vector<8x128xf32>
    %218 = arith.addf %217, %216 : vector<8x128xf32>
    %219 = arith.divf %217, %218 : vector<8x128xf32>
    %220 = vector.extract_strided_slice %207 {offsets = [0, 256], sizes = [8, 128], strides = [1, 1]} : vector<8x512xf32> to vector<8x128xf32>
    %221 = math.tanh %220 : vector<8x128xf32>
    %222 = vector.extract_strided_slice %207 {offsets = [0, 384], sizes = [8, 128], strides = [1, 1]} : vector<8x512xf32> to vector<8x128xf32>
    %223 = arith.negf %222 : vector<8x128xf32>
    %224 = math.exp %223 : vector<8x128xf32>
    %cst_42 = arith.constant 1.000000e+00 : f32
    %225 = vector.broadcast %cst_42 : f32 to vector<8x128xf32>
    %226 = arith.addf %225, %224 : vector<8x128xf32>
    %227 = arith.divf %225, %226 : vector<8x128xf32>
    %228 = arith.mulf %219, %202 : vector<8x128xf32>
    %229 = arith.mulf %213, %221 : vector<8x128xf32>
    %230 = arith.addf %228, %229 : vector<8x128xf32>
    %231 = math.tanh %230 : vector<8x128xf32>
    %232 = arith.mulf %227, %231 : vector<8x128xf32>
    %c0_43 = arith.constant 0 : index
    %c0_44 = arith.constant 0 : index
    %233 = vector.load %arg9[%c0_43, %c0_44] : memref<8x128xf32, #tpu.memory_space<vmem>>, vector<8x128xf32>
    tpu.vector_store %arg9[%c0_43, %c0_44], %232 {strides = array<i32>} : memref<8x128xf32, #tpu.memory_space<vmem>>, vector<8x128xf32>,
    %c0_45 = arith.constant 0 : index
    %c0_46 = arith.constant 0 : index
    %234 = vector.load %arg10[%c0_45, %c0_46] : memref<8x128xf32, #tpu.memory_space<vmem>>, vector<8x128xf32>
    tpu.vector_store %arg10[%c0_45, %c0_46], %230 {strides = array<i32>} : memref<8x128xf32, #tpu.memory_space<vmem>>, vector<8x128xf32>,
    %c0_47 = arith.constant 0 : index
    %c0_48 = arith.constant 0 : index
    %235 = vector.load %arg6[%c0_47, %c0_48] : memref<8x4xf32, #tpu.memory_space<vmem>>, vector<8x4xf32>
    %236 = vector.shape_cast %235 : vector<8x4xf32> to vector<8x1x4xf32>
    %237 = vector.shape_cast %235 : vector<8x4xf32> to vector<8x4x1xf32>
    %238 = vector.broadcast %236 : vector<8x1x4xf32> to vector<8x4x4xf32>
    %239 = vector.broadcast %237 : vector<8x4x1xf32> to vector<8x4x4xf32>
    %240 = arith.cmpf oge, %238, %239 : vector<8x4x4xf32>
    %241 = arith.extui %240 : vector<8x4x4xi1> to vector<8x4x4xi32>
    %242 = arith.sitofp %241 : vector<8x4x4xi32> to vector<8x4x4xf32>
    %cst_49 = arith.constant dense<0.000000e+00> : vector<8x4xf32>
    %243 = vector.multi_reduction <add>, %242, %cst_49 [2] : vector<8x4x4xf32> to vector<8x4xf32>
    %244 = vector.shape_cast %235 : vector<8x4xf32> to vector<8x1x4xf32>
    %245 = vector.broadcast %244 : vector<8x1x4xf32> to vector<8x4x4xf32>
    %246 = arith.mulf %242, %245 : vector<8x4x4xf32>
    %cst_50 = arith.constant dense<0.000000e+00> : vector<8x4xf32>
    %247 = vector.multi_reduction <add>, %246, %cst_50 [2] : vector<8x4x4xf32> to vector<8x4xf32>
    %248 = arith.mulf %243, %235 : vector<8x4xf32>
    %cst_51 = arith.constant 1.000000e+00 : f32
    %249 = vector.broadcast %cst_51 : f32 to vector<8x4xf32>
    %250 = arith.addf %249, %248 : vector<8x4xf32>
    %251 = arith.cmpf ogt, %250, %247 : vector<8x4xf32>
    %252 = arith.extui %251 : vector<8x4xi1> to vector<8x4xi32>
    %253 = arith.sitofp %252 : vector<8x4xi32> to vector<8x4xf32>
    %cst_52 = arith.constant dense<0.000000e+00> : vector<8xf32>
    %254 = vector.multi_reduction <add>, %253, %cst_52 [1] : vector<8x4xf32> to vector<8xf32>
    %255 = vector.shape_cast %254 : vector<8xf32> to vector<8x1xf32>
    %256 = arith.mulf %253, %235 : vector<8x4xf32>
    %cst_53 = arith.constant dense<0.000000e+00> : vector<8xf32>
    %257 = vector.multi_reduction <add>, %256, %cst_53 [1] : vector<8x4xf32> to vector<8xf32>
    %258 = vector.shape_cast %257 : vector<8xf32> to vector<8x1xf32>
    %cst_54 = arith.constant 1.000000e+00 : f32
    %259 = vector.broadcast %cst_54 : f32 to vector<8x1xf32>
    %260 = arith.subf %258, %259 : vector<8x1xf32>
    %261 = arith.divf %260, %255 : vector<8x1xf32>
    %262 = vector.broadcast %261 : vector<8x1xf32> to vector<8x4xf32>
    %263 = arith.subf %235, %262 : vector<8x4xf32>
    %cst_55 = arith.constant 0.000000e+00 : f32
    %264 = vector.broadcast %cst_55 : f32 to vector<8x4xf32>
    %265 = arith.maximumf %263, %264 : vector<8x4xf32>
    %cst_56 = arith.constant 0.000000e+00 : f32
    %266 = vector.broadcast %cst_56 : f32 to vector<8x128xf32>
    %c0_57 = arith.constant 0 : index
    %c0_58 = arith.constant 0 : index
    %c0_59 = arith.constant 0 : index
    %267 = vector.load %arg7[%c0_57, %c0_58, %c0_59] : memref<4x8x128xf32, #tpu.memory_space<vmem>>, vector<1x8x128xf32>
    %268 = vector.shape_cast %267 : vector<1x8x128xf32> to vector<8x128xf32>
    %269 = vector.extract_strided_slice %265 {offsets = [0, 0], sizes = [8, 1], strides = [1, 1]} : vector<8x4xf32> to vector<8x1xf32>
    %270 = vector.broadcast %269 : vector<8x1xf32> to vector<8x128xf32>
    %271 = arith.mulf %268, %270 : vector<8x128xf32>
    %272 = arith.addf %266, %271 : vector<8x128xf32>
    %c1 = arith.constant 1 : index
    %c0_60 = arith.constant 0 : index
    %c0_61 = arith.constant 0 : index
    %273 = vector.load %arg7[%c1, %c0_60, %c0_61] : memref<4x8x128xf32, #tpu.memory_space<vmem>>, vector<1x8x128xf32>
    %274 = vector.shape_cast %273 : vector<1x8x128xf32> to vector<8x128xf32>
    %275 = vector.extract_strided_slice %265 {offsets = [0, 1], sizes = [8, 1], strides = [1, 1]} : vector<8x4xf32> to vector<8x1xf32>
    %276 = vector.broadcast %275 : vector<8x1xf32> to vector<8x128xf32>
    %277 = arith.mulf %274, %276 : vector<8x128xf32>
    %278 = arith.addf %272, %277 : vector<8x128xf32>
    %c2 = arith.constant 2 : index
    %c0_62 = arith.constant 0 : index
    %c0_63 = arith.constant 0 : index
    %279 = vector.load %arg7[%c2, %c0_62, %c0_63] : memref<4x8x128xf32, #tpu.memory_space<vmem>>, vector<1x8x128xf32>
    %280 = vector.shape_cast %279 : vector<1x8x128xf32> to vector<8x128xf32>
    %281 = vector.extract_strided_slice %265 {offsets = [0, 2], sizes = [8, 1], strides = [1, 1]} : vector<8x4xf32> to vector<8x1xf32>
    %282 = vector.broadcast %281 : vector<8x1xf32> to vector<8x128xf32>
    %283 = arith.mulf %280, %282 : vector<8x128xf32>
    %284 = arith.addf %278, %283 : vector<8x128xf32>
    %c3 = arith.constant 3 : index
    %c0_64 = arith.constant 0 : index
    %c0_65 = arith.constant 0 : index
    %285 = vector.load %arg7[%c3, %c0_64, %c0_65] : memref<4x8x128xf32, #tpu.memory_space<vmem>>, vector<1x8x128xf32>
    %286 = vector.shape_cast %285 : vector<1x8x128xf32> to vector<8x128xf32>
    %287 = vector.extract_strided_slice %265 {offsets = [0, 3], sizes = [8, 1], strides = [1, 1]} : vector<8x4xf32> to vector<8x1xf32>
    %288 = vector.broadcast %287 : vector<8x1xf32> to vector<8x128xf32>
    %289 = arith.mulf %286, %288 : vector<8x128xf32>
    %290 = arith.addf %284, %289 : vector<8x128xf32>
    %c0_66 = arith.constant 0 : index
    %291 = memref.load %arg8[%c0_66] : memref<3xf32, #tpu.memory_space<smem>>
    %292 = vector.broadcast %291 : f32 to vector<8x128xf32>
    %293 = arith.mulf %290, %292 : vector<8x128xf32>
    %c1_67 = arith.constant 1 : index
    %294 = memref.load %arg8[%c1_67] : memref<3xf32, #tpu.memory_space<smem>>
    %295 = vector.broadcast %294 : f32 to vector<8x128xf32>
    %296 = arith.mulf %232, %295 : vector<8x128xf32>
    %297 = arith.addf %293, %296 : vector<8x128xf32>
    %c2_68 = arith.constant 2 : index
    %298 = memref.load %arg8[%c2_68] : memref<3xf32, #tpu.memory_space<smem>>
    %299 = vector.broadcast %298 : f32 to vector<8x128xf32>
    %300 = arith.addf %297, %299 : vector<8x128xf32>
    %c0_69 = arith.constant 0 : index
    %c0_70 = arith.constant 0 : index
    %301 = vector.load %arg11[%c0_69, %c0_70] : memref<8x128xf32, #tpu.memory_space<vmem>>, vector<8x128xf32>
    tpu.vector_store %arg11[%c0_69, %c0_70], %300 {strides = array<i32>} : memref<8x128xf32, #tpu.memory_space<vmem>>, vector<8x128xf32>,
    return
  }
}

</mosaic_0001>

<bundles_post_ra>
// kernel: music_generator_forward.1
= control target key start
LH: loop header
LB: loop body
LE: loop exit
PB: predicated region body
PF: predicated region fallthrough
CT: control target
= control target key end

     0   :  { %17 = vsyncpa [#allocation3], 0  ;;  %s3956_s0 = inlined_call_operand.vmem [shape: f32[64,32], index: 0, kind: input, shape index: {}]   ;;  %s3957_s1 = inlined_call_operand.vmem [shape: f32[32,512], index: 1, kind: input, shape index: {}]   ;;  %s3958_s2 = inlined_call_operand.hbm [shape: f32[128,512], index: 2, kind: input, shape index: {}]   ;;  %s3959_s3 = inlined_call_operand.vmem [shape: f32[1,512], index: 3, kind: input, shape index: {}]   ;;  %s3960_s4 = inlined_call_operand.vmem [shape: f32[8,128], index: 4, kind: input, shape index: {}]   ;;  %s3961_s5 = inlined_call_operand.vmem [shape: f32[8,128], index: 5, kind: input, shape index: {}]   ;;  %s3962_s6 = inlined_call_operand.vmem [shape: f32[8,4], index: 6, kind: input, shape index: {}]   ;;  %s3963_s7 = inlined_call_operand.vmem [shape: f32[4,8,128], index: 7, kind: input, shape index: {}]   ;;  %s3964_s8 = inlined_call_operand.vmem [shape: f32[3], index: 8, kind: input, shape index: {}]   ;;  %s3965_s9 = inlined_call_operand.vmem [shape: f32[8,128], index: 9, kind: output, shape index: {0}]   ;;  %s3966_s10 = inlined_call_operand.vmem [shape: f32[8,128], index: 10, kind: output, shape index: {1}]   ;;  %s3967_s11 = inlined_call_operand.vmem [shape: f32[8,128], index: 11, kind: output, shape index: {2}]  }
   0x1   :  { %18 = vsyncpa [#allocation4], 0  ;;  %s2705_s17 = smov [#allocation2]   ;;  %s51_s21 = sshll.u32 %s3964_s8, 4  ;;  %s52_s21 = int_to_ptr.vmem [resolvable:$true] %s51_s21 }
   0x2   :  { %s28_s18 = sshll.u32 %s2705_s17, 4  ;;  %s29_s18 = int_to_ptr.vmem [resolvable:$true] %s28_s18 }
   0x3   :  { %s2677_s22 = scalar_lea.vmem %s29_s18, 8192  ;;  %p2682_p1 = scmp.lt.s32.totalorder %s29_s18, %s29_s18 }
   0x4   :  { %p2678_p0 = scmp.ne.s32.totalorder %s29_s18, %s2677_s22  ;;  %p2683_p2 = scmp.lt.s32.totalorder %s2677_s22, %s2677_s22 }
   0x6   :  { %p2684_p3 = por %p2683_p2, %p2682_p1 }
   0x8   :  { %p2685_p4 = pnand %p2684_p3, %p2678_p0 }
   0xa   :  { %2688 = shalt.err (!%p2685_p4)
}
   0xb   :  { %s2706_s23 = smov 512   ;;  %s2707_s24 = smov 32  }
   0xc   :  { %34 = dma.hbm_to_vmem [thread:$0]  %s3958_s2, 8192, %s29_s18, [#allocation3], %s2706_s23, %s2706_s23, %s2707_s24  }
   0xd   :  { %s2689_s27 = scalar_lea.vmem %s52_s21, 16  ;;  %p2694_p6 = scmp.lt.s32.totalorder %s52_s21, %s52_s21 }
   0xe   :  { %p2690_p5 = scmp.ne.s32.totalorder %s52_s21, %s2689_s27  ;;  %p2695_p7 = scmp.lt.s32.totalorder %s2689_s27, %s2689_s27 }
  0x10   :  { %p2696_p8 = por %p2695_p7, %p2694_p6 }
  0x12   :  { %p2697_p9 = pnand %p2696_p8, %p2690_p5 }
  0x14   :  { %2700 = shalt.err (!%p2697_p9)
}
  0x15   :  { %s2708_s8 = smov [#allocation5]  }
  0x16   :  { %54 = dma.vmem_to_smem %s52_s21, 16, %s2708_s8, [#allocation4]  }
  0x17   :  { %2701 = dma.done.wait [#allocation3], 8192  }
  0x18   :  { %2702 = vsyncadd [#allocation3], 4294959104 }
  0x19   :  { %2703 = dma.done.wait [#allocation4], 16  }
  0x1a   :  { %2704 = vsyncadd [#allocation4], 4294967280 }
  0x1b   :  { %61 = sfence }
  0x1c   :  { %v83_v0 = vld [vmem:[%s3957_s1 + $0x68] sm:$0xff]  ;;  %v85_v1 = vld [vmem:[%s3957_s1 + $0x78] sm:$0xff]  ;;  %v82_v2 = vld [vmem:[%s3957_s1 + $0x60] sm:$0xff]  ;;  %vm108_vm0 = vcmask 261120   ;;  %v3968_v17 = vmov 0.0   ;;  %vm1958_vm1 = vcmask 27648  }
  0x1d   :  { %157 = vmatprep.subr.mxu0 %v83_v0  ;;  %270 = vmatprep.subr.mxu1 %v85_v1  ;;  %v84_v3 = vld [vmem:[%s3957_s1 + $0x70] sm:$0xff]  ;;  %v79_v4 = vld [vmem:[%s3957_s1 + $0x48] sm:$0xff]  ;;  %v81_v5 = vld [vmem:[%s3957_s1 + $0x58] sm:$0xff]  ;;  %s2324_s23 = sld [smem:[#allocation5]] }
  0x1e   :  { %158 = vmatpush1.msra.mxu0 %v82_v2  ;;  %271 = vmatpush1.msra.mxu1 %v84_v3  ;;  %v78_v6 = vld [vmem:[%s3957_s1 + $0x40] sm:$0xff]  ;;  %v80_v7 = vld [vmem:[%s3957_s1 + $0x50] sm:$0xff]  ;;  %v75_v8 = vld [vmem:[%s3957_s1 + $0x28] sm:$0xff]  ;;  %s2409_s26 = sld [smem:[#allocation5 + $0x1]] }
  0x1f   :  { %159 = vmatprep.subr.mxu0 %v79_v4  ;;  %272 = vmatprep.subr.mxu1 %v81_v5  ;;  %v77_v9 = vld [vmem:[%s3957_s1 + $0x38] sm:$0xff]  ;;  %v74_v10 = vld [vmem:[%s3957_s1 + $0x20] sm:$0xff]  ;;  %v76_v11 = vld [vmem:[%s3957_s1 + $0x30] sm:$0xff]  ;;  %s2410_s27 = sld [smem:[#allocation5 + $0x2]] }
  0x20   :  { %160 = vmatpush1.msra.mxu0 %v78_v6  ;;  %273 = vmatpush1.msra.mxu1 %v80_v7  ;;  %v71_v12 = vld [vmem:[%s3957_s1 + $0x8] sm:$0xff]  ;;  %v73_v13 = vld [vmem:[%s3957_s1 + $0x18] sm:$0xff]  ;;  %v70_v14 = vld [vmem:[%s3957_s1] sm:$0xff] }
  0x21   :  { %161 = vmatprep.subr.mxu0 %v75_v8  ;;  %274 = vmatprep.subr.mxu1 %v77_v9  ;;  %v72_v15 = vld [vmem:[%s3957_s1 + $0x10] sm:$0xff]  ;;  %v62_v16 = vld [vmem:[%s3956_s0] sm:$0xff]  ;;  %v2833_v18 = vld [vmem:[#allocation2 + $0x1e8] sm:$0xff] }
  0x22   :  { %162 = vmatpush1.msra.mxu0 %v74_v10  ;;  %275 = vmatpush1.msra.mxu1 %v76_v11  ;;  %4091 = vst [vmem:[#allocation8_spill] sm:$0xff] %v2833_v18  ;;  %v2835_v19 = vld [vmem:[#allocation2 + $0x1f8] sm:$0xff]  ;;  %v2838_v20 = vld [vmem:[#allocation2 + $0x1e0] sm:$0xff]  ;;  %v2840_v21 = vld [vmem:[#allocation2 + $0x1f0] sm:$0xff] }
  0x23   :  { %163 = vmatprep.subr.mxu0 %v71_v12  ;;  %276 = vmatprep.subr.mxu1 %v73_v13  ;;  %4092 = vst [vmem:[#allocation9_spill] sm:$0xff] %v2835_v19  ;;  %v2844_v22 = vld [vmem:[#allocation2 + $0x1c8] sm:$0xff]  ;;  %v2846_v23 = vld [vmem:[#allocation2 + $0x1d8] sm:$0xff]  ;;  %v2852_v24 = vld [vmem:[#allocation2 + $0x1c0] sm:$0xff] }
  0x24   :  { %164 = vmatpush1.msra.mxu0 %v70_v14  ;;  %197 = vmatprep.mubr.f32.mxu0 %v3968_v17  ;;  %v2854_v25 = vld [vmem:[#allocation2 + $0x1d0] sm:$0xff]  ;;  %v63_v26 = vld [vmem:[%s3956_s0 + $0x8] sm:$0xff]  ;;  %v2865_v28 = vld [vmem:[#allocation2 + $0x1b8] sm:$0xff] }
  0x25   :  { %277 = vmatpush1.msra.mxu1 %v72_v15  ;;  %310 = vmatprep.mubr.f32.mxu1 %v3968_v17  ;;  %v2863_v27 = vld [vmem:[#allocation2 + $0x1a8] sm:$0xff]  ;;  %v2869_v29 = vld [vmem:[#allocation2 + $0x1a0] sm:$0xff]  ;;  %v2871_v30 = vld [vmem:[#allocation2 + $0x1b0] sm:$0xff] }
  0x26   :  { %2349 = vmatmul.mubr.msk.f32.vlgmr.msra.gmra.mxu0 %vm108_vm0, %v62_v16  ;;  %2357 = vmatmul.mubr.msk.f32.vlgmr.msra.gmra.mxu1 %vm108_vm0, %v62_v16  ;;  %v2875_v31 = vld [vmem:[#allocation2 + $0x188] sm:$0xff]  ;;  %v2877_v32 = vld [vmem:[#allocation2 + $0x198] sm:$0xff]  ;;  %v2883_v33 = vld [vmem:[#allocation2 + $0x180] sm:$0xff] }
  0x27   :  { %425 = vmatprep.subr.mxu0 %v2833_v18  ;;  %496 = vmatprep.subr.mxu1 %v2835_v19  ;;  %v2885_v34 = vld [vmem:[#allocation2 + $0x190] sm:$0xff]  ;;  %v2894_v36 = vld [vmem:[#allocation2 + $0x168] sm:$0xff]  ;;  %v2896_v37 = vld [vmem:[#allocation2 + $0x178] sm:$0xff] }
  0x28   :  { %426 = vmatpush1.msra.mxu0 %v2838_v20  ;;  %497 = vmatpush1.msra.mxu1 %v2840_v21  ;;  %v64_v35 = vld [vmem:[%s3956_s0 + $0x10] sm:$0xff]  ;;  %v2900_v38 = vld [vmem:[#allocation2 + $0x160] sm:$0xff]  ;;  %v2906_v40 = vld [vmem:[#allocation2 + $0x148] sm:$0xff] }
  0x29   :  { %427 = vmatprep.subr.mxu0 %v2844_v22  ;;  %498 = vmatprep.subr.mxu1 %v2846_v23  ;;  %v2902_v39 = vld [vmem:[#allocation2 + $0x170] sm:$0xff]  ;;  %v2908_v41 = vld [vmem:[#allocation2 + $0x158] sm:$0xff]  ;;  %v2914_v42 = vld [vmem:[#allocation2 + $0x140] sm:$0xff] }
  0x2a   :  { %203 = vmatprep.mubr.f32.mxu0 %v3968_v17  ;;  %316 = vmatprep.mubr.f32.mxu1 %v3968_v17  ;;  %v2916_v43 = vld [vmem:[#allocation2 + $0x150] sm:$0xff]  ;;  %v65_v44 = vld [vmem:[%s3956_s0 + $0x18] sm:$0xff]  ;;  %v2925_v45 = vld [vmem:[#allocation2 + $0x128] sm:$0xff] }
  0x2b   :  { %428 = vmatpush1.msra.mxu0 %v2852_v24  ;;  %499 = vmatpush1.msra.mxu1 %v2854_v25  ;;  %v2927_v46 = vld [vmem:[#allocation2 + $0x138] sm:$0xff]  ;;  %v2931_v47 = vld [vmem:[#allocation2 + $0x120] sm:$0xff]  ;;  %v2933_v48 = vld [vmem:[#allocation2 + $0x130] sm:$0xff] }
  0x2c   :  { %2350 = vmatmul.mubr.msk.f32.gmra.mxu0 %vm108_vm0, %v63_v26  ;;  %2358 = vmatmul.mubr.msk.f32.gmra.mxu1 %vm108_vm0, %v63_v26  ;;  %v2937_v49 = vld [vmem:[#allocation2 + $0x108] sm:$0xff]  ;;  %v2939_v50 = vld [vmem:[#allocation2 + $0x118] sm:$0xff]  ;;  %v2945_v51 = vld [vmem:[#allocation2 + $0x100] sm:$0xff] }
  0x2d   :  { %429 = vmatprep.subr.mxu0 %v2863_v27  ;;  %500 = vmatprep.subr.mxu1 %v2865_v28  ;;  %v2947_v52 = vld [vmem:[#allocation2 + $0x110] sm:$0xff]  ;;  %v66_v53 = vld [vmem:[%s3956_s0 + $0x20] sm:$0xff]  ;;  %v2956_v54 = vld [vmem:[#allocation2 + $0xe8] sm:$0xff] }
  0x2e   :  { %430 = vmatpush1.msra.mxu0 %v2869_v29  ;;  %501 = vmatpush1.msra.mxu1 %v2871_v30  ;;  %v2958_v55 = vld [vmem:[#allocation2 + $0xf8] sm:$0xff]  ;;  %v2962_v56 = vld [vmem:[#allocation2 + $0xe0] sm:$0xff]  ;;  %v2964_v57 = vld [vmem:[#allocation2 + $0xf0] sm:$0xff] }
  0x2f   :  { %431 = vmatprep.subr.mxu0 %v2875_v31  ;;  %502 = vmatprep.subr.mxu1 %v2877_v32  ;;  %v2968_v58 = vld [vmem:[#allocation2 + $0xc8] sm:$0xff]  ;;  %v2970_v59 = vld [vmem:[#allocation2 + $0xd8] sm:$0xff]  ;;  %v2976_v60 = vld [vmem:[#allocation2 + $0xc0] sm:$0xff] }
  0x30   :  { %209 = vmatprep.mubr.f32.mxu0 %v3968_v17  ;;  %322 = vmatprep.mubr.f32.mxu1 %v3968_v17  ;;  %v2978_v61 = vld [vmem:[#allocation2 + $0xd0] sm:$0xff]  ;;  %v67_v62 = vld [vmem:[%s3956_s0 + $0x28] sm:$0xff]  ;;  %v2989_v0 = vld [vmem:[#allocation2 + $0xb8] sm:$0xff] }
  0x31   :  { %432 = vmatpush1.msra.mxu0 %v2883_v33  ;;  %503 = vmatpush1.msra.mxu1 %v2885_v34  ;;  %v2987_v63 = vld [vmem:[#allocation2 + $0xa8] sm:$0xff]  ;;  %v2993_v1 = vld [vmem:[#allocation2 + $0xa0] sm:$0xff]  ;;  %v2995_v2 = vld [vmem:[#allocation2 + $0xb0] sm:$0xff] }
  0x32   :  { %2351 = vmatmul.mubr.msk.f32.gmra.mxu0 %vm108_vm0, %v64_v35  ;;  %2359 = vmatmul.mubr.msk.f32.gmra.mxu1 %vm108_vm0, %v64_v35  ;;  %4093 = vst [vmem:[#allocation10_spill] sm:$0xff] %v2995_v2  ;;  %v2999_v3 = vld [vmem:[#allocation2 + $0x88] sm:$0xff]  ;;  %v3001_v4 = vld [vmem:[#allocation2 + $0x98] sm:$0xff]  ;;  %v3007_v5 = vld [vmem:[#allocation2 + $0x80] sm:$0xff] }
  0x33   :  { %433 = vmatprep.subr.mxu0 %v2894_v36  ;;  %504 = vmatprep.subr.mxu1 %v2896_v37  ;;  %4094 = vst [vmem:[#allocation11_spill] sm:$0xff] %v2999_v3  ;;  %4095 = vst [vmem:[#allocation12_spill] sm:$0xff] %v3001_v4  ;;  %v3009_v6 = vld [vmem:[#allocation2 + $0x90] sm:$0xff]  ;;  %v3018_v8 = vld [vmem:[#allocation2 + $0x68] sm:$0xff] }
  0x34   :  { %434 = vmatpush1.msra.mxu0 %v2900_v38  ;;  %505 = vmatpush1.msra.mxu1 %v2902_v39  ;;  %4096 = vst [vmem:[#allocation13_spill] sm:$0xff] %v3007_v5  ;;  %4097 = vst [vmem:[#allocation14_spill] sm:$0xff] %v3009_v6  ;;  %v68_v7 = vld [vmem:[%s3956_s0 + $0x30] sm:$0xff]  ;;  %v3020_v9 = vld [vmem:[#allocation2 + $0x78] sm:$0xff] }
  0x35   :  { %435 = vmatprep.subr.mxu0 %v2906_v40  ;;  %506 = vmatprep.subr.mxu1 %v2908_v41  ;;  %4098 = vst [vmem:[#allocation15_spill] sm:$0xff] %v3018_v8  ;;  %4099 = vst [vmem:[#allocation16_spill] sm:$0xff] %v3020_v9  ;;  %v3024_v10 = vld [vmem:[#allocation2 + $0x60] sm:$0xff]  ;;  %v3026_v11 = vld [vmem:[#allocation2 + $0x70] sm:$0xff] }
  0x36   :  { %215 = vmatprep.mubr.f32.mxu0 %v3968_v17  ;;  %328 = vmatprep.mubr.f32.mxu1 %v3968_v17  ;;  %4100 = vst [vmem:[#allocation17_spill] sm:$0xff] %v3024_v10  ;;  %4101 = vst [vmem:[#allocation18_spill] sm:$0xff] %v3026_v11  ;;  %v3030_v12 = vld [vmem:[#allocation2 + $0x48] sm:$0xff]  ;;  %v3032_v13 = vld [vmem:[#allocation2 + $0x58] sm:$0xff] }
  0x37   :  { %436 = vmatpush1.msra.mxu0 %v2914_v42  ;;  %507 = vmatpush1.msra.mxu1 %v2916_v43  ;;  %4102 = vst [vmem:[#allocation19_spill] sm:$0xff] %v3030_v12  ;;  %4103 = vst [vmem:[#allocation20_spill] sm:$0xff] %v3032_v13  ;;  %v3038_v14 = vld [vmem:[#allocation2 + $0x40] sm:$0xff]  ;;  %v3040_v15 = vld [vmem:[#allocation2 + $0x50] sm:$0xff] }
  0x38   :  { %2352 = vmatmul.mubr.msk.f32.gmra.mxu0 %vm108_vm0, %v65_v44  ;;  %2360 = vmatmul.mubr.msk.f32.gmra.mxu1 %vm108_vm0, %v65_v44  ;;  %4104 = vst [vmem:[#allocation21_spill] sm:$0xff] %v3038_v14  ;;  %4105 = vst [vmem:[#allocation22_spill] sm:$0xff] %v3040_v15  ;;  %v69_v16 = vld [vmem:[%s3956_s0 + $0x38] sm:$0xff]  ;;  %v3049_v26 = vld [vmem:[#allocation2 + $0x28] sm:$0xff] }
  0x39   :  { %437 = vmatprep.subr.mxu0 %v2925_v45  ;;  %508 = vmatprep.subr.mxu1 %v2927_v46  ;;  %4106 = vst [vmem:[#allocation23_spill] sm:$0xff] %v3049_v26  ;;  %v3051_v35 = vld [vmem:[#allocation2 + $0x38] sm:$0xff]  ;;  %v3055_v44 = vld [vmem:[#allocation2 + $0x20] sm:$0xff] }
  0x3a   :  { %438 = vmatpush1.msra.mxu0 %v2931_v47  ;;  %509 = vmatpush1.msra.mxu1 %v2933_v48  ;;  %4107 = vst [vmem:[#allocation24_spill] sm:$0xff] %v3051_v35  ;;  %4108 = vst [vmem:[#allocation25_spill] sm:$0xff] %v3055_v44 }
  0x3b   :  { %439 = vmatprep.subr.mxu0 %v2937_v49  ;;  %510 = vmatprep.subr.mxu1 %v2939_v50 }
  0x3c   :  { %221 = vmatprep.mubr.f32.mxu0 %v3968_v17  ;;  %334 = vmatprep.mubr.f32.mxu1 %v3968_v17 }
  0x3d   :  { %440 = vmatpush1.msra.mxu0 %v2945_v51  ;;  %511 = vmatpush1.msra.mxu1 %v2947_v52 }
  0x3e   :  { %2353 = vmatmul.mubr.msk.f32.gmra.mxu0 %vm108_vm0, %v66_v53  ;;  %2361 = vmatmul.mubr.msk.f32.gmra.mxu1 %vm108_vm0, %v66_v53  ;;  %v3057_v53 = vld [vmem:[#allocation2 + $0x30] sm:$0xff] }
  0x3f   :  { %441 = vmatprep.subr.mxu0 %v2956_v54  ;;  %512 = vmatprep.subr.mxu1 %v2958_v55  ;;  %4109 = vst [vmem:[#allocation26_spill] sm:$0xff] %v3057_v53 }
  0x40   :  { %442 = vmatpush1.msra.mxu0 %v2962_v56  ;;  %513 = vmatpush1.msra.mxu1 %v2964_v57 }
  0x41   :  { %443 = vmatprep.subr.mxu0 %v2968_v58  ;;  %514 = vmatprep.subr.mxu1 %v2970_v59 }
  0x42   :  { %227 = vmatprep.mubr.f32.mxu0 %v3968_v17  ;;  %340 = vmatprep.mubr.f32.mxu1 %v3968_v17 }
  0x43   :  { %444 = vmatpush1.msra.mxu0 %v2976_v60  ;;  %515 = vmatpush1.msra.mxu1 %v2978_v61 }
  0x44   :  { %2354 = vmatmul.mubr.msk.f32.gmra.mxu0 %vm108_vm0, %v67_v62  ;;  %2362 = vmatmul.mubr.msk.f32.gmra.mxu1 %vm108_vm0, %v67_v62  ;;  %v3061_v62 = vld [vmem:[#allocation2 + $0x8] sm:$0xff] }
  0x45   :  { %445 = vmatprep.subr.mxu0 %v2987_v63  ;;  %516 = vmatprep.subr.mxu1 %v2989_v0  ;;  %4110 = vst [vmem:[#allocation27_spill] sm:$0xff] %v3061_v62 }
  0x46   :  { %446 = vmatpush1.msra.mxu0 %v2993_v1  ;;  %517 = vmatpush1.msra.mxu1 %v2995_v2 }
  0x47   :  { %447 = vmatprep.subr.mxu0 %v2999_v3  ;;  %518 = vmatprep.subr.mxu1 %v3001_v4 }
  0x48   :  { %233 = vmatprep.mubr.f32.mxu0 %v3968_v17  ;;  %346 = vmatprep.mubr.f32.mxu1 %v3968_v17 }
  0x49   :  { %448 = vmatpush1.msra.mxu0 %v3007_v5  ;;  %519 = vmatpush1.msra.mxu1 %v3009_v6 }
  0x4a   :  { %2355 = vmatmul.mubr.msk.f32.gmra.mxu0 %vm108_vm0, %v68_v7  ;;  %2363 = vmatmul.mubr.msk.f32.gmra.mxu1 %vm108_vm0, %v68_v7  ;;  %v3063_v7 = vld [vmem:[#allocation2 + $0x18] sm:$0xff] }
  0x4b   :  { %449 = vmatprep.subr.mxu0 %v3018_v8  ;;  %520 = vmatprep.subr.mxu1 %v3020_v9  ;;  %4111 = vst [vmem:[#allocation28_spill] sm:$0xff] %v3063_v7 }
  0x4c   :  { %450 = vmatpush1.msra.mxu0 %v3024_v10  ;;  %521 = vmatpush1.msra.mxu1 %v3026_v11 }
  0x4d   :  { %451 = vmatprep.subr.mxu0 %v3030_v12  ;;  %522 = vmatprep.subr.mxu1 %v3032_v13 }
  0x4e   :  { %239 = vmatprep.mubr.f32.mxu0 %v3968_v17  ;;  %352 = vmatprep.mubr.f32.mxu1 %v3968_v17  ;;  %v3067_v17 = vld [vmem:[#allocation2] sm:$0xff] }
  0x4f   :  { %452 = vmatpush1.msra.mxu0 %v3038_v14  ;;  %523 = vmatpush1.msra.mxu1 %v3040_v15  ;;  %4112 = vst [vmem:[#allocation29_spill] sm:$0xff] %v3067_v17  ;;  %v3071_v15 = vld [vmem:[#allocation2 + $0x10] sm:$0xff] }
  0x50   :  { %2356 = vmatmul.mubr.msk.f32.gmra.mxu0 %vm108_vm0, %v69_v16  ;;  %2364 = vmatmul.mubr.msk.f32.gmra.mxu1 %vm108_vm0, %v69_v16  ;;  %4113 = vst [vmem:[#allocation30_spill] sm:$0xff] %v3071_v15  ;;  %v423_v16 = vld [vmem:[%s3960_s4] sm:$0xff] }
  0x51   :  { %453 = vmatprep.subr.mxu0 %v3049_v26  ;;  %524 = vmatprep.subr.mxu1 %v3051_v35  ;;  %v4114_v26 = vmov 0.0  }
  0x52   :  { %454 = vmatpush1.msra.mxu0 %v3055_v44  ;;  %525 = vmatpush1.msra.mxu1 %v3057_v53 }
  0x53   :  { %455 = vmatprep.subr.mxu0 %v3061_v62  ;;  %526 = vmatprep.subr.mxu1 %v3063_v7 }
  0x54   :  { %456 = vmatpush1.msra.mxu0 %v3067_v17  ;;  %489 = vmatprep.mubr.f32.mxu0 %v4114_v26 }
  0x55   :  { %527 = vmatpush1.msra.mxu1 %v3071_v15  ;;  %560 = vmatprep.mubr.f32.mxu1 %v4114_v26 }
  0x56   :  { %490 = vmatmul.mubr.f32.vlgmr.msra.gmra.mxu0 %v423_v16  ;;  %561 = vmatmul.mubr.f32.vlgmr.msra.gmra.mxu1 %v423_v16  ;;  %v4115_v16 = vld [vmem:[#allocation22_spill] sm:$0xff] }
  0x57   :  { %595 = vmatprep.subr.mxu0 %v2833_v18  ;;  %666 = vmatprep.subr.mxu1 %v2835_v19 }
  0x58   :  { %596 = vmatpush1.msra.mxu0 %v2838_v20  ;;  %667 = vmatpush1.msra.mxu1 %v2840_v21 }
  0x59   :  { %597 = vmatprep.subr.mxu0 %v2844_v22  ;;  %668 = vmatprep.subr.mxu1 %v2846_v23 }
  0x5a   :  { %598 = vmatpush1.msra.mxu0 %v2852_v24  ;;  %669 = vmatpush1.msra.mxu1 %v2854_v25 }
  0x5b   :  { %599 = vmatprep.subr.mxu0 %v2863_v27  ;;  %670 = vmatprep.subr.mxu1 %v2865_v28 }
  0x5c   :  { %600 = vmatpush1.msra.mxu0 %v2869_v29  ;;  %671 = vmatpush1.msra.mxu1 %v2871_v30 }
  0x5d   :  { %601 = vmatprep.subr.mxu0 %v2875_v31  ;;  %672 = vmatprep.subr.mxu1 %v2877_v32 }
  0x5e   :  { %602 = vmatpush1.msra.mxu0 %v2883_v33  ;;  %673 = vmatpush1.msra.mxu1 %v2885_v34 }
  0x5f   :  { %603 = vmatprep.subr.mxu0 %v2894_v36  ;;  %674 = vmatprep.subr.mxu1 %v2896_v37 }
  0x60   :  { %604 = vmatpush1.msra.mxu0 %v2900_v38  ;;  %675 = vmatpush1.msra.mxu1 %v2902_v39 }
  0x61   :  { %605 = vmatprep.subr.mxu0 %v2906_v40  ;;  %676 = vmatprep.subr.mxu1 %v2908_v41 }
  0x62   :  { %606 = vmatpush1.msra.mxu0 %v2914_v42  ;;  %677 = vmatpush1.msra.mxu1 %v2916_v43 }
  0x63   :  { %607 = vmatprep.subr.mxu0 %v2925_v45  ;;  %678 = vmatprep.subr.mxu1 %v2927_v46 }
  0x64   :  { %608 = vmatpush1.msra.mxu0 %v2931_v47  ;;  %679 = vmatpush1.msra.mxu1 %v2933_v48 }
  0x65   :  { %609 = vmatprep.subr.mxu0 %v2937_v49  ;;  %680 = vmatprep.subr.mxu1 %v2939_v50 }
  0x66   :  { %610 = vmatpush1.msra.mxu0 %v2945_v51  ;;  %681 = vmatpush1.msra.mxu1 %v2947_v52 }
  0x67   :  { %611 = vmatprep.subr.mxu0 %v2956_v54  ;;  %682 = vmatprep.subr.mxu1 %v2958_v55 }
  0x68   :  { %612 = vmatpush1.msra.mxu0 %v2962_v56  ;;  %683 = vmatpush1.msra.mxu1 %v2964_v57 }
  0x69   :  { %613 = vmatprep.subr.mxu0 %v2968_v58  ;;  %684 = vmatprep.subr.mxu1 %v2970_v59 }
  0x6a   :  { %614 = vmatpush1.msra.mxu0 %v2976_v60  ;;  %685 = vmatpush1.msra.mxu1 %v2978_v61 }
  0x6b   :  { %615 = vmatprep.subr.mxu0 %v2987_v63  ;;  %686 = vmatprep.subr.mxu1 %v2989_v0 }
  0x6c   :  { %616 = vmatpush1.msra.mxu0 %v2993_v1  ;;  %687 = vmatpush1.msra.mxu1 %v2995_v2 }
  0x6d   :  { %617 = vmatprep.subr.mxu0 %v2999_v3  ;;  %688 = vmatprep.subr.mxu1 %v3001_v4  ;;  %v4116_v4 = vld [vmem:[#allocation23_spill] sm:$0xff] }
  0x6e   :  { %618 = vmatpush1.msra.mxu0 %v3007_v5  ;;  %689 = vmatpush1.msra.mxu1 %v3009_v6 }
  0x6f   :  { %619 = vmatprep.subr.mxu0 %v3018_v8  ;;  %690 = vmatprep.subr.mxu1 %v3020_v9 }
  0x70   :  { %620 = vmatpush1.msra.mxu0 %v3024_v10  ;;  %691 = vmatpush1.msra.mxu1 %v3026_v11 }
  0x71   :  { %621 = vmatprep.subr.mxu0 %v3030_v12  ;;  %692 = vmatprep.subr.mxu1 %v3032_v13 }
  0x72   :  { %622 = vmatpush1.msra.mxu0 %v3038_v14  ;;  %693 = vmatpush1.msra.mxu1 %v4115_v16 }
  0x73   :  { %623 = vmatprep.subr.mxu0 %v4116_v4  ;;  %694 = vmatprep.subr.mxu1 %v3051_v35  ;;  %v3992_v35 = vlaneseq }
  0x74   :  { %624 = vmatpush1.msra.mxu0 %v3055_v44  ;;  %695 = vmatpush1.msra.mxu1 %v3057_v53 }
  0x75   :  { %625 = vmatprep.subr.mxu0 %v3061_v62  ;;  %696 = vmatprep.subr.mxu1 %v3063_v7  ;;  %v3151_v44 = vshrl.u32 %v3992_v35, 7 }
  0x76   :  { %626 = vmatpush1.msra.mxu0 %v3067_v17  ;;  %659 = vmatprep.mubr.f32.mxu0 %v4114_v26 }
  0x77   :  { %697 = vmatpush1.msra.mxu1 %v3071_v15  ;;  %730 = vmatprep.mubr.f32.mxu1 %v4114_v26  ;;  %4117 = vst [vmem:[#allocation31_spill] sm:$0xff] %v3151_v44  ;;  %v3158_v17 = vsub.s32 0, %v3151_v44  ;;  %v4012_v7 = vsub.s32 2, %v3151_v44  ;;  %v86_v15 = vld [vmem:[%s3959_s3] sm:$0xf]  ;;  %v4019_v35 = vsub.s32 1, %v3151_v44 }
  0x78   :  { %765 = vmatprep.subr.mxu0 %v2833_v18  ;;  %836 = vmatprep.subr.mxu1 %v2835_v19  ;;  %v4020_v26 = vsub.s32 3, %v3151_v44 }
  0x79   :  { %4118 = vst [vmem:[#allocation32_spill] sm:$0xff] %v3158_v17  ;;  %v91_v4 = vrot.slane %v86_v15, %v3158_v17  ;;  %v3173_v16 = vrot.slane %v86_v15, %v4012_v7  ;;  %v95_v12 = vrot.slane %v86_v15, %v4019_v35 }
  0x7a   :  { %v3179_v11 = vrot.slane %v86_v15, %v4020_v26 }
  0xe6   :  { %v3153_v53 = vpop.f32.mrf.mxu0  ;;  %v3155_v62 = vpop.f32.mrf.mxu1 }
  0xe8   :  { %v3164_v18 = vpop.f32.mrf.mxu0  ;;  %v3166_v19 = vpop.f32.mrf.mxu1 }
  0xec   :  { %v205_v14 = vpop.f32.mrf.mxu0  ;;  %v318_v13 = vpop.f32.mrf.mxu1 }
  0xed   :  { %v3181_v10 = vadd.f32 %v205_v14, %v91_v4  ;;  %v3184_v9 = vadd.f32 %v318_v13, %v3173_v16 }
  0xee   :  { %v207_v8 = vpop.f32.mrf.mxu0  ;;  %v320_v17 = vpop.f32.mrf.mxu1 }
  0xef   :  { %4119 = vst [vmem:[#allocation33_spill] sm:$0xff] %v3184_v9  ;;  %v3186_v6 = vadd.f32 %v207_v8, %v95_v12  ;;  %v3189_v7 = vadd.f32 %v320_v17, %v3179_v11 }
  0xf1   :  { %4120 = vst [vmem:[#allocation34_spill] sm:$0xff] %v3186_v6  ;;  %4121 = vst [vmem:[#allocation35_spill] sm:$0xff] %v3189_v7 }
  0xf2   :  { %v211_v5 = vpop.f32.mrf.mxu0  ;;  %v324_v3 = vpop.f32.mrf.mxu1 }
  0xf3   :  { %v3191_v2 = vadd.f32 %v211_v5, %v91_v4  ;;  %v3194_v35 = vadd.f32 %v324_v3, %v3173_v16 }
  0xf4   :  { %v213_v15 = vpop.f32.mrf.mxu0  ;;  %v326_v14 = vpop.f32.mrf.mxu1 }
  0xf5   :  { %4122 = vst [vmem:[#allocation36_spill] sm:$0xff] %v3191_v2  ;;  %4123 = vst [vmem:[#allocation37_spill] sm:$0xff] %v3194_v35  ;;  %v3196_v26 = vadd.f32 %v213_v15, %v95_v12  ;;  %v3199_v13 = vadd.f32 %v326_v14, %v3179_v11 }
  0xf7   :  { %4124 = vst [vmem:[#allocation38_spill] sm:$0xff] %v3196_v26  ;;  %4125 = vst [vmem:[#allocation39_spill] sm:$0xff] %v3199_v13 }
  0xf8   :  { %v217_v44 = vpop.f32.mrf.mxu0  ;;  %v330_v8 = vpop.f32.mrf.mxu1 }
  0xf9   :  { %v3201_v9 = vadd.f32 %v217_v44, %v91_v4  ;;  %v3204_v17 = vadd.f32 %v330_v8, %v3173_v16 }
  0xfa   :  { %v219_v7 = vpop.f32.mrf.mxu0  ;;  %v332_v5 = vpop.f32.mrf.mxu1 }
  0xfb   :  { %4126 = vst [vmem:[#allocation40_spill] sm:$0xff] %v3201_v9  ;;  %4127 = vst [vmem:[#allocation41_spill] sm:$0xff] %v3204_v17  ;;  %v3206_v2 = vadd.f32 %v219_v7, %v95_v12  ;;  %v3209_v3 = vadd.f32 %v332_v5, %v3179_v11 }
  0xfd   :  { %4128 = vst [vmem:[#allocation42_spill] sm:$0xff] %v3206_v2  ;;  %4129 = vst [vmem:[#allocation43_spill] sm:$0xff] %v3209_v3 }
  0xfe   :  { %v223_v35 = vpop.f32.mrf.mxu0  ;;  %v336_v15 = vpop.f32.mrf.mxu1 }
  0xff   :  { %v3211_v26 = vadd.f32 %v223_v35, %v91_v4  ;;  %v3214_v14 = vadd.f32 %v336_v15, %v3173_v16 }
 0x100   :  { %v225_v13 = vpop.f32.mrf.mxu0  ;;  %v338_v44 = vpop.f32.mrf.mxu1 }
 0x101   :  { %4130 = vst [vmem:[#allocation44_spill] sm:$0xff] %v3211_v26  ;;  %4131 = vst [vmem:[#allocation45_spill] sm:$0xff] %v3214_v14  ;;  %v3216_v9 = vadd.f32 %v225_v13, %v95_v12  ;;  %v3219_v8 = vadd.f32 %v338_v44, %v3179_v11 }
 0x103   :  { %4132 = vst [vmem:[#allocation46_spill] sm:$0xff] %v3216_v9  ;;  %4133 = vst [vmem:[#allocation47_spill] sm:$0xff] %v3219_v8 }
 0x104   :  { %v229_v17 = vpop.f32.mrf.mxu0  ;;  %v342_v7 = vpop.f32.mrf.mxu1 }
 0x105   :  { %v3221_v2 = vadd.f32 %v229_v17, %v91_v4  ;;  %v3224_v5 = vadd.f32 %v342_v7, %v3173_v16 }
 0x106   :  { %v231_v3 = vpop.f32.mrf.mxu0  ;;  %v344_v35 = vpop.f32.mrf.mxu1 }
 0x107   :  { %4134 = vst [vmem:[#allocation48_spill] sm:$0xff] %v3221_v2  ;;  %4135 = vst [vmem:[#allocation49_spill] sm:$0xff] %v3224_v5  ;;  %v3226_v26 = vadd.f32 %v231_v3, %v95_v12  ;;  %v3229_v15 = vadd.f32 %v344_v35, %v3179_v11 }
 0x109   :  { %4136 = vst [vmem:[#allocation50_spill] sm:$0xff] %v3226_v26  ;;  %4137 = vst [vmem:[#allocation51_spill] sm:$0xff] %v3229_v15 }
 0x10a   :  { %v235_v14 = vpop.f32.mrf.mxu0  ;;  %v348_v13 = vpop.f32.mrf.mxu1 }
 0x10b   :  { %v3231_v9 = vadd.f32 %v235_v14, %v91_v4  ;;  %v3234_v44 = vadd.f32 %v348_v13, %v3173_v16 }
 0x10c   :  { %v237_v8 = vpop.f32.mrf.mxu0  ;;  %v350_v17 = vpop.f32.mrf.mxu1 }
 0x10d   :  { %4138 = vst [vmem:[#allocation52_spill] sm:$0xff] %v3231_v9  ;;  %4139 = vst [vmem:[#allocation53_spill] sm:$0xff] %v3234_v44  ;;  %v3236_v2 = vadd.f32 %v237_v8, %v95_v12  ;;  %v3239_v7 = vadd.f32 %v350_v17, %v3179_v11  ;;  %v200_v8 = vadd.f32 %v3153_v53, %v91_v4 }
 0x10e   :  { %v202_v17 = vadd.f32 %v3164_v18, %v95_v12 }
 0x10f   :  { %4140 = vst [vmem:[#allocation54_spill] sm:$0xff] %v3236_v2  ;;  %4141 = vst [vmem:[#allocation55_spill] sm:$0xff] %v3239_v7 }
 0x110   :  { %v241_v5 = vpop.f32.mrf.mxu0  ;;  %v354_v3 = vpop.f32.mrf.mxu1 }
 0x111   :  { %v3241_v26 = vadd.f32 %v241_v5, %v91_v4  ;;  %v3244_v35 = vadd.f32 %v354_v3, %v3173_v16 }
 0x112   :  { %v243_v15 = vpop.f32.mrf.mxu0  ;;  %v356_v14 = vpop.f32.mrf.mxu1 }
 0x113   :  { %4142 = vst [vmem:[#allocation56_spill] sm:$0xff] %v3241_v26  ;;  %4143 = vst [vmem:[#allocation57_spill] sm:$0xff] %v3244_v35  ;;  %v3246_v9 = vadd.f32 %v243_v15, %v95_v12  ;;  %v3249_v13 = vadd.f32 %v356_v14, %v3179_v11  ;;  %v315_v15 = vadd.f32 %v3166_v19, %v3179_v11  ;;  %v424_v19 = vld [vmem:[%s3961_s5] sm:$0xff] }
 0x114   :  { %v313_v14 = vadd.f32 %v3155_v62, %v3173_v16 }
 0x115   :  { %4144 = vst [vmem:[#allocation58_spill] sm:$0xff] %v3246_v9  ;;  %4145 = vst [vmem:[#allocation59_spill] sm:$0xff] %v3249_v13 }
 0x116   :  { %v491_v44 = vpop.f32.mrf.mxu0  ;;  %v562_v26 = vpop.f32.mrf.mxu1 }
 0x117   :  { %v567_v7 = vadd.f32 %v491_v44, %v200_v8  ;;  %v569_v13 = vadd.f32 %v562_v26, %v313_v14  ;;  %v4150_v14 = vld [vmem:[#allocation14_spill] sm:$0xff] }
 0x118   :  { %v493_v2 = vpop.f32.mrf.mxu0  ;;  %v564_v35 = vpop.f32.mrf.mxu1 }
 0x119   :  { %v2365_v6 = vmul.f32 -1.442695, %v567_v7  ;;  %v568_v5 = vadd.f32 %v493_v2, %v202_v17  ;;  %v570_v9 = vadd.f32 %v564_v35, %v315_v15  ;;  %v4146_v17 = vld [vmem:[#allocation10_spill] sm:$0xff]  ;;  %v4149_v15 = vld [vmem:[#allocation13_spill] sm:$0xff] }
 0x11b   :  { %2447 = vpow2.f32 %v2365_v6  ;;  %v2366_v3 = vmul.f32 -1.442695, %v568_v5  ;;  %v2367_v4 = vmul.f32 -1.442695, %v570_v9  ;;  %v4147_v5 = vld [vmem:[#allocation11_spill] sm:$0xff] }
 0x11d   :  { %2449 = vpow2.f32 %v2366_v3  ;;  %v4148_v3 = vld [vmem:[#allocation12_spill] sm:$0xff] }
 0x11e   :  { %2451 = vpow2.f32 %v2367_v4  ;;  %v4151_v4 = vld [vmem:[#allocation15_spill] sm:$0xff] }
 0x128   :  { %v2448_v53 = vpop.eup %2447 }
 0x129   :  { %v574_v18 = vadd.f32 1.0, %v2448_v53  ;;  %v4152_v53 = vld [vmem:[#allocation16_spill] sm:$0xff] }
 0x12a   :  { %v2450_v12 = vpop.eup %2449 }
 0x12b   :  { %2453 = vrcp.f32 %v574_v18  ;;  %v580_v2 = vadd.f32 1.0, %v2450_v12  ;;  %v2452_v6 = vpop.eup %2451  ;;  %v4153_v18 = vld [vmem:[#allocation17_spill] sm:$0xff]  ;;  %v4154_v12 = vld [vmem:[#allocation18_spill] sm:$0xff] }
 0x12c   :  { %2455 = vtanh.f32 %v569_v13  ;;  %v587_v35 = vadd.f32 1.0, %v2452_v6  ;;  %v4156_v6 = vld [vmem:[#allocation20_spill] sm:$0xff] }
 0x12d   :  { %2457 = vrcp.f32 %v580_v2  ;;  %v4155_v2 = vld [vmem:[#allocation19_spill] sm:$0xff] }
 0x12e   :  { %2459 = vrcp.f32 %v587_v35  ;;  %v4161_v35 = vld [vmem:[#allocation25_spill] sm:$0xff] }
 0x138   :  { %v2454_v44 = vpop.eup %2453 }
 0x139   :  { %v2456_v11 = vpop.eup %2455 }
 0x13a   :  { %v2458_v7 = vpop.eup %2457  ;;  %v591_v62 = vmul.f32 %v2456_v11, %v2454_v44  ;;  %v4157_v44 = vld [vmem:[#allocation21_spill] sm:$0xff]  ;;  %v4159_v11 = vld [vmem:[#allocation23_spill] sm:$0xff] }
 0x13b   :  { %v590_v9 = vmul.f32 %v2458_v7, %v424_v19  ;;  %v2460_v26 = vpop.eup %2459  ;;  %v4158_v19 = vld [vmem:[#allocation22_spill] sm:$0xff]  ;;  %v4160_v7 = vld [vmem:[#allocation24_spill] sm:$0xff] }
 0x13d   :  { %v3260_v16 = vadd.f32 %v591_v62, %v590_v9  ;;  %v4162_v62 = vld [vmem:[#allocation26_spill] sm:$0xff]  ;;  %v4163_v9 = vld [vmem:[#allocation27_spill] sm:$0xff] }
 0x13f   :  { %2461 = vtanh.f32 %v3260_v16 }
 0x14c   :  { %v2462_v8 = vpop.eup %2461 }
 0x14d   :  { %v594_v13 = vmul.f32 %v2462_v8, %v2460_v26  ;;  %v4164_v26 = vld [vmem:[#allocation28_spill] sm:$0xff]  ;;  %v4165_v8 = vld [vmem:[#allocation29_spill] sm:$0xff] }
 0x14f   :  { %660 = vmatmul.mubr.f32.vlgmr.msra.gmra.mxu0 %v594_v13  ;;  %731 = vmatmul.mubr.f32.vlgmr.msra.gmra.mxu1 %v594_v13  ;;  %v4166_v13 = vmov 0.0  }
 0x150   :  { %766 = vmatpush1.msra.mxu0 %v2838_v20  ;;  %837 = vmatpush1.msra.mxu1 %v2840_v21 }
 0x151   :  { %767 = vmatprep.subr.mxu0 %v2844_v22  ;;  %838 = vmatprep.subr.mxu1 %v2846_v23 }
 0x152   :  { %768 = vmatpush1.msra.mxu0 %v2852_v24  ;;  %839 = vmatpush1.msra.mxu1 %v2854_v25 }
 0x153   :  { %769 = vmatprep.subr.mxu0 %v2863_v27  ;;  %840 = vmatprep.subr.mxu1 %v2865_v28 }
 0x154   :  { %770 = vmatpush1.msra.mxu0 %v2869_v29  ;;  %841 = vmatpush1.msra.mxu1 %v2871_v30 }
 0x155   :  { %771 = vmatprep.subr.mxu0 %v2875_v31  ;;  %842 = vmatprep.subr.mxu1 %v2877_v32 }
 0x156   :  { %772 = vmatpush1.msra.mxu0 %v2883_v33  ;;  %843 = vmatpush1.msra.mxu1 %v2885_v34 }
 0x157   :  { %773 = vmatprep.subr.mxu0 %v2894_v36  ;;  %844 = vmatprep.subr.mxu1 %v2896_v37 }
 0x158   :  { %774 = vmatpush1.msra.mxu0 %v2900_v38  ;;  %845 = vmatpush1.msra.mxu1 %v2902_v39 }
 0x159   :  { %775 = vmatprep.subr.mxu0 %v2906_v40  ;;  %846 = vmatprep.subr.mxu1 %v2908_v41 }
 0x15a   :  { %776 = vmatpush1.msra.mxu0 %v2914_v42  ;;  %847 = vmatpush1.msra.mxu1 %v2916_v43 }
 0x15b   :  { %777 = vmatprep.subr.mxu0 %v2925_v45  ;;  %848 = vmatprep.subr.mxu1 %v2927_v46 }
 0x15c   :  { %778 = vmatpush1.msra.mxu0 %v2931_v47  ;;  %849 = vmatpush1.msra.mxu1 %v2933_v48 }
 0x15d   :  { %779 = vmatprep.subr.mxu0 %v2937_v49  ;;  %850 = vmatprep.subr.mxu1 %v2939_v50 }
 0x15e   :  { %780 = vmatpush1.msra.mxu0 %v2945_v51  ;;  %851 = vmatpush1.msra.mxu1 %v2947_v52 }
 0x15f   :  { %781 = vmatprep.subr.mxu0 %v2956_v54  ;;  %852 = vmatprep.subr.mxu1 %v2958_v55 }
 0x160   :  { %782 = vmatpush1.msra.mxu0 %v2962_v56  ;;  %853 = vmatpush1.msra.mxu1 %v2964_v57 }
 0x161   :  { %783 = vmatprep.subr.mxu0 %v2968_v58  ;;  %854 = vmatprep.subr.mxu1 %v2970_v59 }
 0x162   :  { %784 = vmatpush1.msra.mxu0 %v2976_v60  ;;  %855 = vmatpush1.msra.mxu1 %v2978_v61 }
 0x163   :  { %785 = vmatprep.subr.mxu0 %v2987_v63  ;;  %856 = vmatprep.subr.mxu1 %v2989_v0 }
 0x164   :  { %786 = vmatpush1.msra.mxu0 %v2993_v1  ;;  %857 = vmatpush1.msra.mxu1 %v4146_v17 }
 0x165   :  { %787 = vmatprep.subr.mxu0 %v4147_v5  ;;  %858 = vmatprep.subr.mxu1 %v4148_v3 }
 0x166   :  { %788 = vmatpush1.msra.mxu0 %v4149_v15  ;;  %859 = vmatpush1.msra.mxu1 %v4150_v14 }
 0x167   :  { %789 = vmatprep.subr.mxu0 %v4151_v4  ;;  %860 = vmatprep.subr.mxu1 %v4152_v53  ;;  %v4172_v53 = vld [vmem:[#allocation33_spill] sm:$0xff] }
 0x168   :  { %790 = vmatpush1.msra.mxu0 %v4153_v18  ;;  %861 = vmatpush1.msra.mxu1 %v4154_v12  ;;  %v4171_v18 = vld [vmem:[#allocation35_spill] sm:$0xff] }
 0x169   :  { %791 = vmatprep.subr.mxu0 %v4155_v2  ;;  %862 = vmatprep.subr.mxu1 %v4156_v6  ;;  %v4167_v6 = vld [vmem:[#allocation30_spill] sm:$0xff] }
 0x16a   :  { %792 = vmatpush1.msra.mxu0 %v4157_v44  ;;  %863 = vmatpush1.msra.mxu1 %v4158_v19  ;;  %v4168_v19 = vld [vmem:[#allocation8_spill] sm:$0xff] }
 0x16b   :  { %793 = vmatprep.subr.mxu0 %v4159_v11  ;;  %864 = vmatprep.subr.mxu1 %v4160_v7  ;;  %v4169_v11 = vld [vmem:[#allocation9_spill] sm:$0xff] }
 0x16c   :  { %794 = vmatpush1.msra.mxu0 %v4161_v35  ;;  %865 = vmatpush1.msra.mxu1 %v4162_v62 }
 0x16d   :  { %795 = vmatprep.subr.mxu0 %v4163_v9  ;;  %866 = vmatprep.subr.mxu1 %v4164_v26  ;;  %v4170_v9 = vld [vmem:[#allocation34_spill] sm:$0xff] }
 0x16e   :  { %796 = vmatpush1.msra.mxu0 %v4165_v8  ;;  %829 = vmatprep.mubr.f32.mxu0 %v4166_v13 }
 0x16f   :  { %867 = vmatpush1.msra.mxu1 %v4167_v6  ;;  %900 = vmatprep.mubr.f32.mxu1 %v4166_v13 }
 0x170   :  { %935 = vmatprep.subr.mxu0 %v4168_v19  ;;  %1006 = vmatprep.subr.mxu1 %v4169_v11 }
 0x20f   :  { %v661_v7 = vpop.f32.mrf.mxu0  ;;  %v732_v26 = vpop.f32.mrf.mxu1 }
 0x210   :  { %v737_v35 = vadd.f32 %v661_v7, %v3181_v10  ;;  %v739_v13 = vadd.f32 %v732_v26, %v4172_v53 }
 0x211   :  { %v663_v62 = vpop.f32.mrf.mxu0  ;;  %v734_v12 = vpop.f32.mrf.mxu1 }
 0x212   :  { %v2368_v44 = vmul.f32 -1.442695, %v737_v35  ;;  %v738_v2 = vadd.f32 %v663_v62, %v4170_v9  ;;  %v740_v6 = vadd.f32 %v734_v12, %v4171_v18 }
 0x214   :  { %2463 = vpow2.f32 %v2368_v44  ;;  %v2369_v8 = vmul.f32 -1.442695, %v738_v2  ;;  %v2370_v4 = vmul.f32 -1.442695, %v740_v6 }
 0x216   :  { %2465 = vpow2.f32 %v2369_v8 }
 0x217   :  { %2467 = vtanh.f32 %v739_v13  ;;  %v4193_v13 = vld [vmem:[#allocation39_spill] sm:$0xff] }
 0x218   :  { %2469 = vpow2.f32 %v2370_v4 }
 0x221   :  { %v2464_v19 = vpop.eup %2463 }
 0x222   :  { %v744_v14 = vadd.f32 1.0, %v2464_v19 }
 0x223   :  { %v2466_v11 = vpop.eup %2465 }
 0x224   :  { %2471 = vrcp.f32 %v744_v14  ;;  %v750_v10 = vadd.f32 1.0, %v2466_v11  ;;  %v2468_v7 = vpop.eup %2467  ;;  %v4194_v11 = vld [vmem:[#allocation37_spill] sm:$0xff] }
 0x225   :  { %v2470_v35 = vpop.eup %2469 }
 0x226   :  { %2473 = vrcp.f32 %v750_v10  ;;  %v757_v9 = vadd.f32 1.0, %v2470_v35 }
 0x228   :  { %2475 = vrcp.f32 %v757_v9 }
 0x231   :  { %v2472_v44 = vpop.eup %2471 }
 0x232   :  { %v761_v62 = vmul.f32 %v2472_v44, %v2468_v7 }
 0x233   :  { %v2474_v2 = vpop.eup %2473 }
 0x234   :  { %v760_v8 = vmul.f32 %v2474_v2, %v3260_v16 }
 0x235   :  { %v2476_v53 = vpop.eup %2475 }
 0x236   :  { %v3334_v18 = vadd.f32 %v761_v62, %v760_v8 }
 0x238   :  { %2477 = vtanh.f32 %v3334_v18 }
 0x245   :  { %v2478_v12 = vpop.eup %2477 }
 0x246   :  { %v764_v6 = vmul.f32 %v2478_v12, %v2476_v53 }
 0x248   :  { %830 = vmatmul.mubr.f32.vlgmr.msra.gmra.mxu0 %v764_v6  ;;  %901 = vmatmul.mubr.f32.vlgmr.msra.gmra.mxu1 %v764_v6 }
 0x249   :  { %936 = vmatpush1.msra.mxu0 %v2838_v20  ;;  %1007 = vmatpush1.msra.mxu1 %v2840_v21  ;;  %v4173_v20 = vld [vmem:[#allocation14_spill] sm:$0xff]  ;;  %v4174_v21 = vld [vmem:[#allocation15_spill] sm:$0xff] }
 0x24a   :  { %937 = vmatprep.subr.mxu0 %v2844_v22  ;;  %1008 = vmatprep.subr.mxu1 %v2846_v23  ;;  %v4175_v22 = vld [vmem:[#allocation16_spill] sm:$0xff]  ;;  %v4176_v23 = vld [vmem:[#allocation17_spill] sm:$0xff] }
 0x24b   :  { %938 = vmatpush1.msra.mxu0 %v2852_v24  ;;  %1009 = vmatpush1.msra.mxu1 %v2854_v25  ;;  %v4177_v24 = vld [vmem:[#allocation18_spill] sm:$0xff]  ;;  %v4178_v25 = vld [vmem:[#allocation19_spill] sm:$0xff] }
 0x24c   :  { %939 = vmatprep.subr.mxu0 %v2863_v27  ;;  %1010 = vmatprep.subr.mxu1 %v2865_v28  ;;  %v4179_v27 = vld [vmem:[#allocation20_spill] sm:$0xff]  ;;  %v4180_v28 = vld [vmem:[#allocation21_spill] sm:$0xff] }
 0x24d   :  { %940 = vmatpush1.msra.mxu0 %v2869_v29  ;;  %1011 = vmatpush1.msra.mxu1 %v2871_v30  ;;  %v4181_v29 = vld [vmem:[#allocation22_spill] sm:$0xff]  ;;  %v4182_v30 = vld [vmem:[#allocation23_spill] sm:$0xff] }
 0x24e   :  { %941 = vmatprep.subr.mxu0 %v2875_v31  ;;  %1012 = vmatprep.subr.mxu1 %v2877_v32  ;;  %v4183_v31 = vld [vmem:[#allocation24_spill] sm:$0xff]  ;;  %v4184_v32 = vld [vmem:[#allocation25_spill] sm:$0xff] }
 0x24f   :  { %942 = vmatpush1.msra.mxu0 %v2883_v33  ;;  %1013 = vmatpush1.msra.mxu1 %v2885_v34  ;;  %v4185_v33 = vld [vmem:[#allocation26_spill] sm:$0xff]  ;;  %v4186_v34 = vld [vmem:[#allocation27_spill] sm:$0xff] }
 0x250   :  { %943 = vmatprep.subr.mxu0 %v2894_v36  ;;  %1014 = vmatprep.subr.mxu1 %v2896_v37  ;;  %v4187_v36 = vld [vmem:[#allocation28_spill] sm:$0xff]  ;;  %v4188_v37 = vld [vmem:[#allocation29_spill] sm:$0xff] }
 0x251   :  { %944 = vmatpush1.msra.mxu0 %v2900_v38  ;;  %1015 = vmatpush1.msra.mxu1 %v2902_v39  ;;  %v4189_v38 = vmov 0.0   ;;  %v4190_v39 = vld [vmem:[#allocation30_spill] sm:$0xff] }
 0x252   :  { %945 = vmatprep.subr.mxu0 %v2906_v40  ;;  %1016 = vmatprep.subr.mxu1 %v2908_v41  ;;  %v3401_v40 = vld [vmem:[#allocation2 + $0x1e8] sm:$0xff]  ;;  %v3404_v41 = vld [vmem:[#allocation2 + $0x1f8] sm:$0xff] }
 0x253   :  { %946 = vmatpush1.msra.mxu0 %v2914_v42  ;;  %1017 = vmatpush1.msra.mxu1 %v2916_v43  ;;  %v4191_v43 = vld [vmem:[#allocation36_spill] sm:$0xff] }
 0x254   :  { %947 = vmatprep.subr.mxu0 %v2925_v45  ;;  %1018 = vmatprep.subr.mxu1 %v2927_v46 }
 0x255   :  { %948 = vmatpush1.msra.mxu0 %v2931_v47  ;;  %1019 = vmatpush1.msra.mxu1 %v2933_v48  ;;  %v4192_v48 = vld [vmem:[#allocation38_spill] sm:$0xff] }
 0x256   :  { %949 = vmatprep.subr.mxu0 %v2937_v49  ;;  %1020 = vmatprep.subr.mxu1 %v2939_v50 }
 0x257   :  { %950 = vmatpush1.msra.mxu0 %v2945_v51  ;;  %1021 = vmatpush1.msra.mxu1 %v2947_v52 }
 0x258   :  { %951 = vmatprep.subr.mxu0 %v2956_v54  ;;  %1022 = vmatprep.subr.mxu1 %v2958_v55 }
 0x259   :  { %952 = vmatpush1.msra.mxu0 %v2962_v56  ;;  %1023 = vmatpush1.msra.mxu1 %v2964_v57 }
 0x25a   :  { %953 = vmatprep.subr.mxu0 %v2968_v58  ;;  %1024 = vmatprep.subr.mxu1 %v2970_v59 }
 0x25b   :  { %954 = vmatpush1.msra.mxu0 %v2976_v60  ;;  %1025 = vmatpush1.msra.mxu1 %v2978_v61 }
 0x25c   :  { %955 = vmatprep.subr.mxu0 %v2987_v63  ;;  %1026 = vmatprep.subr.mxu1 %v2989_v0 }
 0x25d   :  { %956 = vmatpush1.msra.mxu0 %v2993_v1  ;;  %1027 = vmatpush1.msra.mxu1 %v4146_v17 }
 0x25e   :  { %957 = vmatprep.subr.mxu0 %v4147_v5  ;;  %1028 = vmatprep.subr.mxu1 %v4148_v3 }
 0x25f   :  { %958 = vmatpush1.msra.mxu0 %v4149_v15  ;;  %1029 = vmatpush1.msra.mxu1 %v4173_v20 }
 0x260   :  { %959 = vmatprep.subr.mxu0 %v4174_v21  ;;  %1030 = vmatprep.subr.mxu1 %v4175_v22 }
 0x261   :  { %960 = vmatpush1.msra.mxu0 %v4176_v23  ;;  %1031 = vmatpush1.msra.mxu1 %v4177_v24 }
 0x262   :  { %961 = vmatprep.subr.mxu0 %v4178_v25  ;;  %1032 = vmatprep.subr.mxu1 %v4179_v27 }
 0x263   :  { %962 = vmatpush1.msra.mxu0 %v4180_v28  ;;  %1033 = vmatpush1.msra.mxu1 %v4181_v29 }
 0x264   :  { %963 = vmatprep.subr.mxu0 %v4182_v30  ;;  %1034 = vmatprep.subr.mxu1 %v4183_v31 }
 0x265   :  { %964 = vmatpush1.msra.mxu0 %v4184_v32  ;;  %1035 = vmatpush1.msra.mxu1 %v4185_v33 }
 0x266   :  { %965 = vmatprep.subr.mxu0 %v4186_v34  ;;  %1036 = vmatprep.subr.mxu1 %v4187_v36 }
 0x267   :  { %966 = vmatpush1.msra.mxu0 %v4188_v37  ;;  %999 = vmatprep.mubr.f32.mxu0 %v4189_v38 }
 0x268   :  { %1037 = vmatpush1.msra.mxu1 %v4190_v39  ;;  %1070 = vmatprep.mubr.f32.mxu1 %v4189_v38 }
 0x269   :  { %1105 = vmatprep.subr.mxu0 %v3401_v40  ;;  %1176 = vmatprep.subr.mxu1 %v3404_v41 }
 0x308   :  { %v831_v42 = vpop.f32.mrf.mxu0  ;;  %v902_v14 = vpop.f32.mrf.mxu1 }
 0x309   :  { %v907_v45 = vadd.f32 %v831_v42, %v4191_v43  ;;  %v909_v10 = vadd.f32 %v902_v14, %v4194_v11  ;;  %v3418_v14 = vld [vmem:[#allocation2 + $0x1f0] sm:$0xff]  ;;  %v3436_v11 = vld [vmem:[#allocation2 + $0x1b8] sm:$0xff] }
 0x30a   :  { %v833_v46 = vpop.f32.mrf.mxu0  ;;  %v904_v26 = vpop.f32.mrf.mxu1 }
 0x30b   :  { %v2371_v47 = vmul.f32 -1.442695, %v907_v45  ;;  %v908_v16 = vadd.f32 %v833_v46, %v4192_v48  ;;  %v910_v19 = vadd.f32 %v904_v26, %v4193_v13  ;;  %v3427_v26 = vld [vmem:[#allocation2 + $0x1c0] sm:$0xff]  ;;  %v3430_v13 = vld [vmem:[#allocation2 + $0x1d0] sm:$0xff] }
 0x30d   :  { %2479 = vpow2.f32 %v2371_v47  ;;  %v2372_v4 = vmul.f32 -1.442695, %v908_v16  ;;  %v2373_v7 = vmul.f32 -1.442695, %v910_v19  ;;  %v3415_v16 = vld [vmem:[#allocation2 + $0x1e0] sm:$0xff]  ;;  %v3433_v19 = vld [vmem:[#allocation2 + $0x1a8] sm:$0xff] }
 0x30f   :  { %2481 = vpow2.f32 %v2372_v4  ;;  %v3421_v4 = vld [vmem:[#allocation2 + $0x1c8] sm:$0xff] }
 0x310   :  { %2483 = vtanh.f32 %v909_v10  ;;  %v3439_v10 = vld [vmem:[#allocation2 + $0x1a0] sm:$0xff] }
 0x311   :  { %2485 = vpow2.f32 %v2373_v7  ;;  %v3442_v7 = vld [vmem:[#allocation2 + $0x1b0] sm:$0xff] }
 0x31a   :  { %v2480_v35 = vpop.eup %2479 }
 0x31b   :  { %v914_v44 = vadd.f32 1.0, %v2480_v35  ;;  %v3445_v35 = vld [vmem:[#allocation2 + $0x188] sm:$0xff] }
 0x31c   :  { %v2482_v62 = vpop.eup %2481 }
 0x31d   :  { %2487 = vrcp.f32 %v914_v44  ;;  %v920_v2 = vadd.f32 1.0, %v2482_v62  ;;  %v2484_v9 = vpop.eup %2483  ;;  %v3448_v44 = vld [vmem:[#allocation2 + $0x198] sm:$0xff]  ;;  %v3451_v62 = vld [vmem:[#allocation2 + $0x180] sm:$0xff] }
 0x31e   :  { %v2486_v8 = vpop.eup %2485 }
 0x31f   :  { %2489 = vrcp.f32 %v920_v2  ;;  %v927_v42 = vadd.f32 1.0, %v2486_v8  ;;  %v3454_v2 = vld [vmem:[#allocation2 + $0x190] sm:$0xff]  ;;  %v3460_v8 = vld [vmem:[#allocation2 + $0x178] sm:$0xff] }
 0x321   :  { %2491 = vrcp.f32 %v927_v42  ;;  %v3472_v42 = vld [vmem:[#allocation2 + $0x158] sm:$0xff] }
 0x322   :  { %4196 = vst [vmem:[#allocation11_spill] sm:$0xff] %v3472_v42 }
 0x32a   :  { %v2488_v53 = vpop.eup %2487 }
 0x32b   :  { %v931_v12 = vmul.f32 %v2488_v53, %v2484_v9  ;;  %v3457_v9 = vld [vmem:[#allocation2 + $0x168] sm:$0xff]  ;;  %v3463_v53 = vld [vmem:[#allocation2 + $0x160] sm:$0xff] }
 0x32c   :  { %v2490_v6 = vpop.eup %2489 }
 0x32d   :  { %v930_v43 = vmul.f32 %v2490_v6, %v3334_v18  ;;  %v3424_v18 = vld [vmem:[#allocation2 + $0x1d8] sm:$0xff]  ;;  %v3469_v6 = vld [vmem:[#allocation2 + $0x148] sm:$0xff] }
 0x32e   :  { %v2492_v46 = vpop.eup %2491  ;;  %4195 = vst [vmem:[#allocation10_spill] sm:$0xff] %v3469_v6 }
 0x32f   :  { %v3412_v45 = vadd.f32 %v931_v12, %v930_v43  ;;  %v3466_v12 = vld [vmem:[#allocation2 + $0x170] sm:$0xff]  ;;  %v3475_v43 = vld [vmem:[#allocation2 + $0x140] sm:$0xff] }
 0x331   :  { %2493 = vtanh.f32 %v3412_v45 }
 0x33e   :  { %v2494_v47 = vpop.eup %2493 }
 0x33f   :  { %v934_v48 = vmul.f32 %v2494_v47, %v2492_v46  ;;  %v3478_v46 = vld [vmem:[#allocation2 + $0x150] sm:$0xff]  ;;  %v3481_v47 = vld [vmem:[#allocation2 + $0x128] sm:$0xff] }
 0x341   :  { %1000 = vmatmul.mubr.f32.vlgmr.msra.gmra.mxu0 %v934_v48  ;;  %1071 = vmatmul.mubr.f32.vlgmr.msra.gmra.mxu1 %v934_v48  ;;  %v3484_v48 = vld [vmem:[#allocation2 + $0x138] sm:$0xff] }
 0x342   :  { %1106 = vmatpush1.msra.mxu0 %v3415_v16  ;;  %1177 = vmatpush1.msra.mxu1 %v3418_v14 }
 0x343   :  { %1107 = vmatprep.subr.mxu0 %v3421_v4  ;;  %1178 = vmatprep.subr.mxu1 %v3424_v18 }
 0x344   :  { %1108 = vmatpush1.msra.mxu0 %v3427_v26  ;;  %1179 = vmatpush1.msra.mxu1 %v3430_v13 }
 0x345   :  { %1109 = vmatprep.subr.mxu0 %v3433_v19  ;;  %1180 = vmatprep.subr.mxu1 %v3436_v11 }
 0x346   :  { %1110 = vmatpush1.msra.mxu0 %v3439_v10  ;;  %1181 = vmatpush1.msra.mxu1 %v3442_v7 }
 0x347   :  { %1111 = vmatprep.subr.mxu0 %v3445_v35  ;;  %1182 = vmatprep.subr.mxu1 %v3448_v44 }
 0x348   :  { %1112 = vmatpush1.msra.mxu0 %v3451_v62  ;;  %1183 = vmatpush1.msra.mxu1 %v3454_v2 }
 0x349   :  { %1113 = vmatprep.subr.mxu0 %v3457_v9  ;;  %1184 = vmatprep.subr.mxu1 %v3460_v8 }
 0x34a   :  { %1114 = vmatpush1.msra.mxu0 %v3463_v53  ;;  %1185 = vmatpush1.msra.mxu1 %v3466_v12 }
 0x34b   :  { %1115 = vmatprep.subr.mxu0 %v3469_v6  ;;  %1186 = vmatprep.subr.mxu1 %v3472_v42  ;;  %v3487_v6 = vld [vmem:[#allocation2 + $0x120] sm:$0xff]  ;;  %v3490_v42 = vld [vmem:[#allocation2 + $0x130] sm:$0xff] }
 0x34c   :  { %1116 = vmatpush1.msra.mxu0 %v3475_v43  ;;  %1187 = vmatpush1.msra.mxu1 %v3478_v46 }
 0x34d   :  { %1117 = vmatprep.subr.mxu0 %v3481_v47  ;;  %1188 = vmatprep.subr.mxu1 %v3484_v48 }
 0x34e   :  { %1118 = vmatpush1.msra.mxu0 %v3487_v6  ;;  %1189 = vmatpush1.msra.mxu1 %v3490_v42 }
 0x34f   :  { %1119 = vmatprep.subr.mxu0 %v2937_v49  ;;  %1190 = vmatprep.subr.mxu1 %v2939_v50  ;;  %v3536_v49 = vld [vmem:[%s3962_s6] sm:$0xff] }
 0x350   :  { %1120 = vmatpush1.msra.mxu0 %v2945_v51  ;;  %1191 = vmatpush1.msra.mxu1 %v2947_v52  ;;  %4197 = vst [vmem:[#allocation12_spill] sm:$0xff] %v3536_v49  ;;  %v4198_v50 = vld [vmem:[#allocation32_spill] sm:$0xff]  ;;  %v4199_v52 = vld [vmem:[#allocation31_spill] sm:$0xff] }
 0x351   :  { %1121 = vmatprep.subr.mxu0 %v2956_v54  ;;  %1192 = vmatprep.subr.mxu1 %v2958_v55  ;;  %v1841_v51 = vrot.slane %v3536_v49, %v4198_v50  ;;  %v4200_v54 = vsub.s32 2, %v4199_v52 }
 0x352   :  { %1122 = vmatpush1.msra.mxu0 %v2962_v56  ;;  %1193 = vmatpush1.msra.mxu1 %v2964_v57  ;;  %v4201_v56 = vsub.s32 3, %v4199_v52 }
 0x353   :  { %1123 = vmatprep.subr.mxu0 %v2968_v58  ;;  %1194 = vmatprep.subr.mxu1 %v2970_v59  ;;  %v1855_v55 = vrot.slane %v3536_v49, %v4200_v54  ;;  %v4202_v58 = vsub.s32 1, %v4199_v52 }
 0x354   :  { %1124 = vmatpush1.msra.mxu0 %v2976_v60  ;;  %1195 = vmatpush1.msra.mxu1 %v2978_v61  ;;  %v1862_v57 = vrot.slane %v3536_v49, %v4201_v56  ;;  %v1875_v60 = vsub.s32 5, %v4199_v52  ;;  %v1868_v61 = vsub.s32 4, %v4199_v52 }
 0x355   :  { %1125 = vmatprep.subr.mxu0 %v2987_v63  ;;  %1196 = vmatprep.subr.mxu1 %v2989_v0  ;;  %v1848_v59 = vrot.slane %v3536_v49, %v4202_v58  ;;  %v1882_v63 = vsub.s32 6, %v4199_v52  ;;  %v1889_v0 = vsub.s32 7, %v4199_v52 }
 0x356   :  { %1126 = vmatpush1.msra.mxu0 %v2993_v1  ;;  %1197 = vmatpush1.msra.mxu1 %v4146_v17  ;;  %v1876_v1 = vrot.slane %v3536_v49, %v1875_v60  ;;  %v1869_v17 = vrot.slane %v3536_v49, %v1868_v61 }
 0x357   :  { %1127 = vmatprep.subr.mxu0 %v4147_v5  ;;  %1198 = vmatprep.subr.mxu1 %v4148_v3  ;;  %v3556_v5 = vrot.slane %v3536_v49, %v1882_v63  ;;  %v3559_v3 = vrot.slane %v3536_v49, %v1889_v0 }
 0x358   :  { %1128 = vmatpush1.msra.mxu0 %v4149_v15  ;;  %1199 = vmatpush1.msra.mxu1 %v4173_v20  ;;  %v2710_v15 = vmov 1966171168  }
 0x359   :  { %1129 = vmatprep.subr.mxu0 %v4174_v21  ;;  %1200 = vmatprep.subr.mxu1 %v4175_v22  ;;  %v1791_v20 = vunpack.c.l.s4 %v2710_v15 }
 0x35a   :  { %1130 = vmatpush1.msra.mxu0 %v4176_v23  ;;  %1201 = vmatpush1.msra.mxu1 %v4177_v24  ;;  %v4203_v23 = vld [vmem:[#allocation40_spill] sm:$0xff] }
 0x35b   :  { %1131 = vmatprep.subr.mxu0 %v4178_v25  ;;  %1202 = vmatprep.subr.mxu1 %v4179_v27  ;;  %v1792_v21 = vunpack.c.0.s8 %v1791_v20 }
 0x35c   :  { %1132 = vmatpush1.msra.mxu0 %v4180_v28  ;;  %1203 = vmatpush1.msra.mxu1 %v4181_v29  ;;  %v4204_v28 = vld [vmem:[#allocation42_spill] sm:$0xff] }
 0x35d   :  { %1133 = vmatprep.subr.mxu0 %v4182_v30  ;;  %1204 = vmatprep.subr.mxu1 %v4183_v31  ;;  %v1795_v30 = vsub.s32 %v1792_v21, %v4199_v52 }
 0x35e   :  { %1134 = vmatpush1.msra.mxu0 %v4184_v32  ;;  %1205 = vmatpush1.msra.mxu1 %v4185_v33 }
 0x35f   :  { %1135 = vmatprep.subr.mxu0 %v4186_v34  ;;  %1206 = vmatprep.subr.mxu1 %v4187_v36  ;;  %v1796_v33 = vrot.slane %v3536_v49, %v1795_v30  ;;  %v1789_v36 = vcombine.high %v3536_v49, %v3536_v49  ;;  %v3735_v49 = vld [vmem:[#allocation2 + $0x8] sm:$0xff] }
 0x360   :  { %1136 = vmatpush1.msra.mxu0 %v4188_v37  ;;  %1169 = vmatprep.mubr.f32.mxu0 %v4189_v38  ;;  %4236 = vst [vmem:[#allocation32_spill] sm:$0xff] %v3735_v49 }
 0x361   :  { %1207 = vmatpush1.msra.mxu1 %v4190_v39  ;;  %1240 = vmatprep.mubr.f32.mxu1 %v4189_v38  ;;  %v1812_v37 = vrot.slane %v1796_v33, %v1795_v30  ;;  %v1804_v39 = vcombine.high %v1796_v33, %v1796_v33  ;;  %v1803_v56 = vrot.slane %v1789_v36, %v1795_v30 }
 0x362   :  { %1275 = vmatprep.subr.mxu0 %v3401_v40  ;;  %1346 = vmatprep.subr.mxu1 %v3404_v41 }
 0x363   :  { %1843 = vbcast.lane.b32.xlu0 %v1841_v51, 256  ;;  %1857 = vbcast.lane.b32.xlu1 %v1855_v55, 256  ;;  %v1826_v60 = vrot.slane %v1804_v39, %v1795_v30 }
 0x365   :  { %v1836_v20 = vcombine.high %v1826_v60, %v1826_v60 }
 0x367   :  { %1864 = vbcast.lane.b32.xlu1 %v1862_v57, 256  ;;  %1850 = vbcast.lane.b32.xlu0 %v1848_v59, 256 }
 0x36b   :  { %1878 = vbcast.lane.b32.xlu1 %v1876_v1, 256  ;;  %1871 = vbcast.lane.b32.xlu0 %v1869_v17, 256 }
 0x36f   :  { %1885 = vbcast.lane.b32.xlu0 %v3556_v5, 256  ;;  %1892 = vbcast.lane.b32.xlu1 %v3559_v3, 256 }
 0x373   :  { %2020 = vbcast.lane.b32.xlu1 %v1841_v51, 256  ;;  %2027 = vbcast.lane.b32.xlu0 %v1848_v59, 256  ;;  %v4205_v51 = vld [vmem:[#allocation43_spill] sm:$0xff]  ;;  %v3572_v59 = vrot.slane %v1812_v37, %v4198_v50 }
 0x377   :  { %2034 = vbcast.lane.b32.xlu1 %v1855_v55, 256  ;;  %2048 = vbcast.lane.b32.xlu0 %v1869_v17, 256  ;;  %v1834_v55 = vcombine.high %v1812_v37, %v1812_v37  ;;  %v1805_v17 = vcombine.high %v1803_v56, %v1803_v56 }
 0x37b   :  { %2041 = vbcast.lane.b32.xlu1 %v1862_v57, 256  ;;  %v4206_v57 = vld [vmem:[#allocation41_spill] sm:$0xff] }
 0x37f   :  { %2055 = vbcast.lane.b32.xlu1 %v1876_v1, 256  ;;  %v1905_v1 = vrot.slane %v1834_v55, %v4198_v50 }
 0x3d5   :  { %v1844_v0 = vpop.permute.xlu0 %1843 }
 0x3d6   :  { %vm1934_vm2 = vcmp.ge.f32.partialorder %v3572_v59, %v1844_v0 }
 0x3d9   :  { %v1851_v36 = vpop.permute.xlu0 %1850 }
 0x401   :  { %v1001_v22 = vpop.f32.mrf.mxu0  ;;  %v1072_v31 = vpop.f32.mrf.mxu1 }
 0x402   :  { %v1077_v24 = vadd.f32 %v1001_v22, %v4203_v23  ;;  %v1079_v58 = vadd.f32 %v1072_v31, %v4206_v57  ;;  %v2389_v22 = vsel %vm1934_vm2, 1.0, %v4189_v38  ;;  %v1901_v31 = vrot.slane %v1826_v60, %v4198_v50  ;;  %v1872_v60 = vpop.permute.xlu0 %1871 }
 0x403   :  { %v1003_v25 = vpop.f32.mrf.mxu0  ;;  %v1074_v34 = vpop.f32.mrf.mxu1  ;;  %vm2185_vm2 = vcmask 1041409  }
 0x404   :  { %v2374_v27 = vmul.f32 -1.442695, %v1077_v24  ;;  %v1078_v29 = vadd.f32 %v1003_v25, %v4204_v28  ;;  %v1080_v54 = vadd.f32 %v1074_v34, %v4205_v51  ;;  %v1959_v24 = vsel %vm1958_vm1, %v2389_v22, 0.0  ;;  %v1858_v25 = vpop.permute.xlu1 %1857 }
 0x405   :  { %1960 = vadd.xlane.f32.xlu0 %v1959_v24  ;;  %v1819_v28 = vrot.slane %v1803_v56, %v1795_v30  ;;  %vm1936_vm3 = vcmp.ge.f32.partialorder %v1905_v1, %v1858_v25  ;;  %vm1935_vm5 = vcmp.ge.f32.partialorder %v1901_v31, %v1851_v36 }
 0x406   :  { %2495 = vpow2.f32 %v2374_v27  ;;  %v2375_v32 = vmul.f32 -1.442695, %v1078_v29  ;;  %v2376_v61 = vmul.f32 -1.442695, %v1080_v54  ;;  %v1833_v27 = vrot.slane %v1805_v17, %v1795_v30 }
 0x407   :  { %v1909_v29 = vrot.slane %v1836_v20, %v4198_v50  ;;  %v1913_v37 = vrot.slane %v1819_v28, %v4198_v50  ;;  %v1835_v39 = vcombine.high %v1819_v28, %v1819_v28  ;;  %v2390_v55 = vsel %vm1935_vm5, 1.0, %v4189_v38 }
 0x408   :  { %2497 = vpow2.f32 %v2375_v32  ;;  %v2391_v32 = vsel %vm1936_vm3, 1.0, %v4189_v38  ;;  %v1865_v34 = vpop.permute.xlu1 %1864  ;;  %v1917_v30 = vrot.slane %v1833_v27, %v4198_v50  ;;  %v1837_v51 = vcombine.high %v1833_v27, %v1833_v27  ;;  %v1886_v27 = vpop.permute.xlu0 %1885 }
 0x409   :  { %2499 = vtanh.f32 %v1079_v58  ;;  %v1965_v33 = vsel %vm1958_vm1, %v2391_v32, 0.0  ;;  %vm1937_vm4 = vcmp.ge.f32.partialorder %v1909_v29, %v1865_v34  ;;  %v1962_v57 = vsel %vm1958_vm1, %v2390_v55, 0.0 }
 0x40a   :  { %2501 = vpow2.f32 %v2376_v61  ;;  %1966 = vadd.xlane.f32.xlu0 %v1965_v33  ;;  %v2392_v54 = vsel %vm1937_vm4, 1.0, %v4189_v38  ;;  %1963 = vadd.xlane.f32.xlu1 %v1962_v57  ;;  %v1921_v61 = vrot.slane %v1835_v39, %v4198_v50  ;;  %vm1938_vm7 = vcmp.ge.f32.partialorder %v1913_v37, %v1872_v60 }
 0x40b   :  { %v1968_v56 = vsel %vm1958_vm1, %v2392_v54, 0.0  ;;  %v1984_v0 = vmul.f32 %v2390_v55, %v1901_v31  ;;  %v2393_v20 = vsel %vm1938_vm7, 1.0, %v4189_v38  ;;  %v1985_v33 = vmul.f32 %v2391_v32, %v1905_v1 }
 0x40c   :  { %v1879_v58 = vpop.permute.xlu1 %1878  ;;  %v1971_v24 = vsel %vm1958_vm1, %v2393_v20, 0.0  ;;  %vm1940_vm8 = vcmp.ge.f32.partialorder %v1921_v61, %v1886_v27  ;;  %v1983_v57 = vmul.f32 %v2389_v22, %v3572_v59  ;;  %v1986_v60 = vmul.f32 %v2392_v54, %v1909_v29 }
 0x40d   :  { %vm1939_vm6 = vcmp.ge.f32.partialorder %v1917_v30, %v1879_v58  ;;  %v2395_v39 = vsel %vm1940_vm8, 1.0, %v4189_v38  ;;  %v1997_v32 = vsel %vm1958_vm1, %v1985_v33, 0.0  ;;  %v3650_v33 = vld [vmem:[#allocation2 + $0xe8] sm:$0xff]  ;;  %vm2187_vm3 = vcmask 1042434  }
 0x40e   :  { %1969 = vadd.xlane.f32.xlu0 %v1968_v56  ;;  %1972 = vadd.xlane.f32.xlu1 %v1971_v24  ;;  %v1977_v56 = vsel %vm1958_vm1, %v2395_v39, 0.0  ;;  %v1989_v24 = vmul.f32 %v2395_v39, %v1921_v61  ;;  %v4208_v61 = vld [vmem:[#allocation11_spill] sm:$0xff]  ;;  %v3669_v39 = vld [vmem:[#allocation2 + $0xc0] sm:$0xff]  ;;  %vm2189_vm4 = vcmask 1043459   ;;  %vm2191_vm5 = vcmask 1044484  }
 0x40f   :  { %4214 = vst [vmem:[#allocation33_spill] sm:$0xff] %v3669_v39  ;;  %vm2195_vm7 = vcmask 1046534   ;;  %vm2197_vm8 = vcmask 1047559  }
 0x410   :  { %v1893_v28 = vpop.permute.xlu1 %1892  ;;  %v2009_v54 = vsel %vm1958_vm1, %v1989_v24, 0.0  ;;  %v3717_v24 = vld [vmem:[#allocation2 + $0x40] sm:$0xff] }
 0x411   :  { %4230 = vst [vmem:[#allocation29_spill] sm:$0xff] %v3717_v24 }
 0x412   :  { %1978 = vadd.xlane.f32.xlu1 %v1977_v56  ;;  %v3678_v56 = vld [vmem:[#allocation2 + $0xb8] sm:$0xff] }
 0x413   :  { %v2496_v63 = vpop.eup %2495  ;;  %4217 = vst [vmem:[#allocation16_spill] sm:$0xff] %v3678_v56 }
 0x414   :  { %v1084_v15 = vadd.f32 1.0, %v2496_v63  ;;  %v1925_v63 = vrot.slane %v1837_v51, %v4198_v50  ;;  %v1994_v50 = vsel %vm1958_vm1, %v1984_v0, 0.0  ;;  %v1991_v0 = vsel %vm1958_vm1, %v1983_v57, 0.0  ;;  %v3684_v57 = vld [vmem:[#allocation2 + $0xb0] sm:$0xff] }
 0x415   :  { %v2498_v21 = vpop.eup %2497  ;;  %4219 = vst [vmem:[#allocation18_spill] sm:$0xff] %v3684_v57 }
 0x416   :  { %2503 = vrcp.f32 %v1084_v15  ;;  %v1090_v23 = vadd.f32 1.0, %v2498_v21  ;;  %v2500_v17 = vpop.eup %2499  ;;  %v2394_v15 = vsel %vm1939_vm6, 1.0, %v4189_v38  ;;  %vm1941_vm9 = vcmp.ge.f32.partialorder %v1925_v63, %v1893_v28  ;;  %v3647_v28 = vld [vmem:[#allocation2 + $0x110] sm:$0xff] }
 0x417   :  { %v2502_v21 = vpop.eup %2501  ;;  %v2396_v51 = vsel %vm1941_vm9, 1.0, %v4189_v38  ;;  %vm2193_vm6 = vcmask 1045509   ;;  %vm2200_vm9 = vcmask 31744  }
 0x418   :  { %2505 = vrcp.f32 %v1090_v23  ;;  %v1974_v23 = vsel %vm1958_vm1, %v2394_v15, 0.0  ;;  %v1097_v36 = vadd.f32 1.0, %v2502_v21  ;;  %v1980_v58 = vsel %vm1958_vm1, %v2396_v51, 0.0 }
 0x419   :  { %1975 = vadd.xlane.f32.xlu0 %v1974_v23  ;;  %1981 = vadd.xlane.f32.xlu1 %v1980_v58  ;;  %v1987_v21 = vmul.f32 %v2393_v20, %v1913_v37  ;;  %v1990_v23 = vmul.f32 %v2396_v51, %v1925_v63  ;;  %v4207_v37 = vld [vmem:[#allocation10_spill] sm:$0xff]  ;;  %v3638_v63 = vld [vmem:[#allocation2 + $0x108] sm:$0xff]  ;;  %v3644_v20 = vld [vmem:[#allocation2 + $0x100] sm:$0xff] }
 0x41a   :  { %2507 = vrcp.f32 %v1097_v36  ;;  %v3666_v36 = vld [vmem:[#allocation2 + $0xd8] sm:$0xff]  ;;  %v3672_v51 = vld [vmem:[#allocation2 + $0xd0] sm:$0xff] }
 0x41b   :  { %v2003_v22 = vsel %vm1958_vm1, %v1987_v21, 0.0  ;;  %v2012_v29 = vsel %vm1958_vm1, %v1990_v23, 0.0  ;;  %4213 = vst [vmem:[#allocation35_spill] sm:$0xff] %v3666_v36  ;;  %4215 = vst [vmem:[#allocation14_spill] sm:$0xff] %v3672_v51  ;;  %v3690_v58 = vld [vmem:[#allocation2 + $0x98] sm:$0xff]  ;;  %v3705_v21 = vld [vmem:[#allocation2 + $0x60] sm:$0xff] }
 0x41c   :  { %4221 = vst [vmem:[#allocation20_spill] sm:$0xff] %v3690_v58  ;;  %4226 = vst [vmem:[#allocation25_spill] sm:$0xff] %v3705_v21  ;;  %v3714_v23 = vld [vmem:[#allocation2 + $0x58] sm:$0xff] }
 0x41d   :  { %1995 = vadd.xlane.f32.xlu0 %v1994_v50  ;;  %1992 = vadd.xlane.f32.xlu1 %v1991_v0  ;;  %v3659_v50 = vld [vmem:[#allocation2 + $0xf0] sm:$0xff]  ;;  %v3699_v0 = vld [vmem:[#allocation2 + $0x68] sm:$0xff]  ;;  %4229 = vst [vmem:[#allocation28_spill] sm:$0xff] %v3714_v23 }
 0x41e   :  { %4211 = vst [vmem:[#allocation9_spill] sm:$0xff] %v3659_v50  ;;  %4224 = vst [vmem:[#allocation23_spill] sm:$0xff] %v3699_v0 }
 0x421   :  { %1998 = vadd.xlane.f32.xlu0 %v1997_v32  ;;  %2004 = vadd.xlane.f32.xlu1 %v2003_v22  ;;  %v3687_v32 = vld [vmem:[#allocation2 + $0x88] sm:$0xff] }
 0x422   :  { %4220 = vst [vmem:[#allocation19_spill] sm:$0xff] %v3687_v32  ;;  %v3711_v22 = vld [vmem:[#allocation2 + $0x48] sm:$0xff] }
 0x423   :  { %v2504_v25 = vpop.eup %2503  ;;  %4228 = vst [vmem:[#allocation27_spill] sm:$0xff] %v3711_v22 }
 0x424   :  { %v1101_v34 = vmul.f32 %v2504_v25, %v2500_v17  ;;  %v1988_v17 = vmul.f32 %v2394_v15, %v1917_v30  ;;  %v3641_v15 = vld [vmem:[#allocation2 + $0x118] sm:$0xff] }
 0x425   :  { %v2506_v31 = vpop.eup %2505  ;;  %2010 = vadd.xlane.f32.xlu1 %v2009_v54  ;;  %v3723_v54 = vld [vmem:[#allocation2 + $0x28] sm:$0xff] }
 0x426   :  { %v1100_v55 = vmul.f32 %v2506_v31, %v3412_v45  ;;  %v2000_v45 = vsel %vm1958_vm1, %v1986_v60, 0.0  ;;  %v2006_v59 = vsel %vm1958_vm1, %v1988_v17, 0.0  ;;  %v3662_v31 = vld [vmem:[#allocation2 + $0xc8] sm:$0xff]  ;;  %v3693_v60 = vld [vmem:[#allocation2 + $0x80] sm:$0xff]  ;;  %v3702_v17 = vld [vmem:[#allocation2 + $0x78] sm:$0xff]  ;;  %4232 = vst [vmem:[#allocation36_spill] sm:$0xff] %v3723_v54 }
 0x427   :  { %2001 = vadd.xlane.f32.xlu0 %v2000_v45  ;;  %v2508_v25 = vpop.eup %2507  ;;  %4212 = vst [vmem:[#allocation34_spill] sm:$0xff] %v3662_v31  ;;  %4222 = vst [vmem:[#allocation21_spill] sm:$0xff] %v3693_v60  ;;  %v3696_v45 = vld [vmem:[#allocation2 + $0x90] sm:$0xff] }
 0x428   :  { %v3600_v1 = vadd.f32 %v1101_v34, %v1100_v55  ;;  %v3656_v34 = vld [vmem:[#allocation2 + $0xe0] sm:$0xff]  ;;  %v3675_v55 = vld [vmem:[#allocation2 + $0xa8] sm:$0xff]  ;;  %4223 = vst [vmem:[#allocation22_spill] sm:$0xff] %v3696_v45  ;;  %4225 = vst [vmem:[#allocation24_spill] sm:$0xff] %v3702_v17 }
 0x429   :  { %4210 = vst [vmem:[#allocation8_spill] sm:$0xff] %v3656_v34  ;;  %4216 = vst [vmem:[#allocation15_spill] sm:$0xff] %v3675_v55 }
 0x42a   :  { %2509 = vtanh.f32 %v3600_v1 }
 0x42b   :  { %2007 = vadd.xlane.f32.xlu0 %v2006_v59  ;;  %v3708_v59 = vld [vmem:[#allocation2 + $0x70] sm:$0xff] }
 0x42c   :  { %4227 = vst [vmem:[#allocation26_spill] sm:$0xff] %v3708_v59 }
 0x42f   :  { %2013 = vadd.xlane.f32.xlu0 %v2012_v29  ;;  %v3720_v29 = vld [vmem:[#allocation2 + $0x50] sm:$0xff] }
 0x430   :  { %4231 = vst [vmem:[#allocation30_spill] sm:$0xff] %v3720_v29 }
 0x436   :  { %2069 = vbcast.lane.b32.xlu1 %v3559_v3, 256  ;;  %v3653_v3 = vld [vmem:[#allocation2 + $0xf8] sm:$0xff] }
 0x437   :  { %v2510_v27 = vpop.eup %2509  ;;  %4209 = vst [vmem:[#allocation13_spill] sm:$0xff] %v3653_v3 }
 0x438   :  { %v1104_v30 = vmul.f32 %v2510_v27, %v2508_v25  ;;  %v3726_v25 = vld [vmem:[#allocation2 + $0x38] sm:$0xff]  ;;  %v3729_v27 = vld [vmem:[#allocation2 + $0x20] sm:$0xff] }
 0x439   :  { %4233 = vst [vmem:[#allocation38_spill] sm:$0xff] %v3726_v25  ;;  %4234 = vst [vmem:[#allocation39_spill] sm:$0xff] %v3729_v27 }
 0x43a   :  { %1170 = vmatmul.mubr.f32.vlgmr.msra.gmra.mxu0 %v1104_v30  ;;  %1241 = vmatmul.mubr.f32.vlgmr.msra.gmra.mxu1 %v1104_v30  ;;  %v3732_v30 = vld [vmem:[#allocation2 + $0x30] sm:$0xff] }
 0x43b   :  { %1276 = vmatpush1.msra.mxu0 %v3415_v16  ;;  %1347 = vmatpush1.msra.mxu1 %v3418_v14  ;;  %4235 = vst [vmem:[#allocation37_spill] sm:$0xff] %v3732_v30 }
 0x43c   :  { %1277 = vmatprep.subr.mxu0 %v3421_v4  ;;  %1348 = vmatprep.subr.mxu1 %v3424_v18 }
 0x43d   :  { %1278 = vmatpush1.msra.mxu0 %v3427_v26  ;;  %1349 = vmatpush1.msra.mxu1 %v3430_v13 }
 0x43e   :  { %1279 = vmatprep.subr.mxu0 %v3433_v19  ;;  %1350 = vmatprep.subr.mxu1 %v3436_v11 }
 0x43f   :  { %1280 = vmatpush1.msra.mxu0 %v3439_v10  ;;  %1351 = vmatpush1.msra.mxu1 %v3442_v7 }
 0x440   :  { %1281 = vmatprep.subr.mxu0 %v3445_v35  ;;  %1352 = vmatprep.subr.mxu1 %v3448_v44 }
 0x441   :  { %1282 = vmatpush1.msra.mxu0 %v3451_v62  ;;  %1353 = vmatpush1.msra.mxu1 %v3454_v2 }
 0x442   :  { %1283 = vmatprep.subr.mxu0 %v3457_v9  ;;  %1354 = vmatprep.subr.mxu1 %v3460_v8 }
 0x443   :  { %1284 = vmatpush1.msra.mxu0 %v3463_v53  ;;  %1355 = vmatpush1.msra.mxu1 %v3466_v12 }
 0x444   :  { %1285 = vmatprep.subr.mxu0 %v4207_v37  ;;  %1356 = vmatprep.subr.mxu1 %v4208_v61 }
 0x445   :  { %1286 = vmatpush1.msra.mxu0 %v3475_v43  ;;  %1357 = vmatpush1.msra.mxu1 %v3478_v46 }
 0x446   :  { %1287 = vmatprep.subr.mxu0 %v3481_v47  ;;  %1358 = vmatprep.subr.mxu1 %v3484_v48 }
 0x447   :  { %1288 = vmatpush1.msra.mxu0 %v3487_v6  ;;  %1359 = vmatpush1.msra.mxu1 %v3490_v42 }
 0x448   :  { %1289 = vmatprep.subr.mxu0 %v3638_v63  ;;  %1360 = vmatprep.subr.mxu1 %v3641_v15 }
 0x449   :  { %1290 = vmatpush1.msra.mxu0 %v3644_v20  ;;  %1361 = vmatpush1.msra.mxu1 %v3647_v28 }
 0x44a   :  { %1291 = vmatprep.subr.mxu0 %v3650_v33  ;;  %1362 = vmatprep.subr.mxu1 %v3653_v3 }
 0x44b   :  { %1292 = vmatpush1.msra.mxu0 %v3656_v34  ;;  %1363 = vmatpush1.msra.mxu1 %v3659_v50 }
 0x44c   :  { %1293 = vmatprep.subr.mxu0 %v3662_v31  ;;  %2062 = vbcast.lane.b32.xlu0 %v3556_v5, 256  ;;  %v3681_v5 = vld [vmem:[#allocation2 + $0xa0] sm:$0xff] }
 0x44d   :  { %1364 = vmatprep.subr.mxu1 %v3666_v36  ;;  %1294 = vmatpush1.msra.mxu0 %v3669_v39  ;;  %4218 = vst [vmem:[#allocation17_spill] sm:$0xff] %v3681_v5  ;;  %v2711_v39 = vmov 0  }
 0x44e   :  { %1365 = vmatpush1.msra.mxu1 %v3672_v51  ;;  %1295 = vmatprep.subr.mxu0 %v3675_v55 }
 0x44f   :  { %1366 = vmatprep.subr.mxu1 %v3678_v56  ;;  %1296 = vmatpush1.msra.mxu0 %v3681_v5 }
 0x450   :  { %1367 = vmatpush1.msra.mxu1 %v3684_v57  ;;  %1297 = vmatprep.subr.mxu0 %v3687_v32 }
 0x451   :  { %1368 = vmatprep.subr.mxu1 %v3690_v58  ;;  %1298 = vmatpush1.msra.mxu0 %v3693_v60 }
 0x452   :  { %1369 = vmatpush1.msra.mxu1 %v3696_v45  ;;  %1299 = vmatprep.subr.mxu0 %v3699_v0 }
 0x453   :  { %1370 = vmatprep.subr.mxu1 %v3702_v17  ;;  %1300 = vmatpush1.msra.mxu0 %v3705_v21 }
 0x454   :  { %1371 = vmatpush1.msra.mxu1 %v3708_v59  ;;  %1301 = vmatprep.subr.mxu0 %v3711_v22 }
 0x455   :  { %1372 = vmatprep.subr.mxu1 %v3714_v23  ;;  %1302 = vmatpush1.msra.mxu0 %v3717_v24 }
 0x456   :  { %1373 = vmatpush1.msra.mxu1 %v3720_v29  ;;  %1303 = vmatprep.subr.mxu0 %v3723_v54  ;;  %v3738_v29 = vld [vmem:[#allocation2 + $0x18] sm:$0xff]  ;;  %v3741_v54 = vld [vmem:[#allocation2] sm:$0xff] }
 0x457   :  { %1374 = vmatprep.subr.mxu1 %v3726_v25  ;;  %1304 = vmatpush1.msra.mxu0 %v3729_v27  ;;  %4237 = vst [vmem:[#allocation31_spill] sm:$0xff] %v3738_v29  ;;  %4238 = vst [vmem:[#allocation40_spill] sm:$0xff] %v3741_v54  ;;  %v3745_v25 = vld [vmem:[#allocation2 + $0x10] sm:$0xff] }
 0x458   :  { %1375 = vmatpush1.msra.mxu1 %v3732_v30  ;;  %1305 = vmatprep.subr.mxu0 %v3735_v49  ;;  %4239 = vst [vmem:[#allocation42_spill] sm:$0xff] %v3745_v25  ;;  %v2021_v49 = vpop.permute.xlu1 %2020  ;;  %v3751_v30 = vpop.permute.xlu0 %2027 }
 0x459   :  { %1376 = vmatprep.subr.mxu1 %v3738_v29  ;;  %1306 = vmatpush1.msra.mxu0 %v3741_v54 }
 0x45a   :  { %1339 = vmatprep.mubr.f32.mxu0 %v4189_v38  ;;  %1377 = vmatpush1.msra.mxu1 %v3745_v25 }
 0x45b   :  { %1410 = vmatprep.mubr.f32.mxu1 %v4189_v38  ;;  %1445 = vmatprep.subr.mxu0 %v3401_v40 }
 0x45c   :  { %1516 = vmatprep.subr.mxu1 %v3404_v41  ;;  %v2035_v29 = vpop.permute.xlu1 %2034  ;;  %v2049_v27 = vpop.permute.xlu0 %2048  ;;  %2427 = vset.pattern.permute.xlu1 %v2711_v39 }
 0x45d   :  { %2421 = vset.pattern.permute.xlu0 %v2711_v39 }
 0x460   :  { %v3753_v24 = vpop.permute.xlu1 %2041 }
 0x464   :  { %v3755_v23 = vpop.permute.xlu1 %2055 }
 0x48e   :  { %v1961_v54 = vpop.xlane.xlu0 %1960 }
 0x48f   :  { %v2079_v45 = vmul.f32 %v2021_v49, %v1961_v54 }
 0x491   :  { %v2087_v5 = vadd.f32 1.0, %v2079_v45 }
 0x493   :  { %v1967_v22 = vpop.xlane.xlu0 %1966  ;;  %v1964_v59 = vpop.xlane.xlu1 %1963 }
 0x494   :  { %v2081_v0 = vmul.f32 %v2035_v29, %v1967_v22  ;;  %v2080_v40 = vmul.f32 %v3751_v30, %v1964_v59 }
 0x496   :  { %v2089_v32 = vadd.f32 1.0, %v2081_v0  ;;  %v2088_v57 = vadd.f32 1.0, %v2080_v40 }
 0x497   :  { %v1970_v21 = vpop.xlane.xlu0 %1969  ;;  %v1973_v25 = vpop.xlane.xlu1 %1972 }
 0x498   :  { %v2082_v41 = vmul.f32 %v3753_v24, %v1970_v21  ;;  %v2083_v36 = vmul.f32 %v2049_v27, %v1973_v25 }
 0x49a   :  { %v2090_v56 = vadd.f32 1.0, %v2082_v41  ;;  %v2091_v0 = vadd.f32 1.0, %v2083_v36 }
 0x49b   :  { %v1979_v60 = vpop.xlane.xlu1 %1978 }
 0x4a2   :  { %v1976_v17 = vpop.xlane.xlu0 %1975  ;;  %v1982_v55 = vpop.xlane.xlu1 %1981 }
 0x4a3   :  { %v2084_v31 = vmul.f32 %v3755_v23, %v1976_v17 }
 0x4a5   :  { %v2092_v40 = vadd.f32 1.0, %v2084_v31 }
 0x4a6   :  { %v1996_v58 = vpop.xlane.xlu0 %1995  ;;  %v1993_v22 = vpop.xlane.xlu1 %1992 }
 0x4a7   :  { %vm2096_vm10 = vcmp.gt.f32.partialorder %v2088_v57, %v1996_v58  ;;  %vm2095_vm12 = vcmp.gt.f32.partialorder %v2087_v5, %v1993_v22 }
 0x4a8   :  { %v2398_v59 = vsel %vm2096_vm10, 1.0, %v4189_v38  ;;  %v2397_v45 = vsel %vm2095_vm12, 1.0, %v4189_v38 }
 0x4a9   :  { %v2422_v39 = vpack.i.bf16 %v2398_v59, %v2397_v45 }
 0x4aa   :  { %v1999_v51 = vpop.xlane.xlu0 %1998  ;;  %v2005_v50 = vpop.xlane.xlu1 %2004 }
 0x4ab   :  { %vm2097_vm11 = vcmp.gt.f32.partialorder %v2089_v32, %v1999_v51  ;;  %vm2099_vm14 = vcmp.gt.f32.partialorder %v2091_v0, %v2005_v50  ;;  %2423 = vperm.xlu0 %2421, %v2422_v39  }
 0x4ac   :  { %v2399_v21 = vsel %vm2097_vm11, 1.0, %v4189_v38  ;;  %v2401_v51 = vsel %vm2099_vm14, 1.0, %v4189_v38 }
 0x4ad   :  { %v2206_v22 = vmul.f32 %v2399_v21, %v2035_v29  ;;  %v2208_v0 = vmul.f32 %v2401_v51, %v2049_v27  ;;  %v4240_v29 = vld [vmem:[#allocation44_spill] sm:$0xff] }
 0x4ae   :  { %v2011_v31 = vpop.xlane.xlu1 %2010 }
 0x4b0   :  { %v2002_v54 = vpop.xlane.xlu0 %2001 }
 0x4b1   :  { %vm2098_vm13 = vcmp.gt.f32.partialorder %v2090_v56, %v2002_v54  ;;  %v2204_v56 = vmul.f32 %v2397_v45, %v2021_v49  ;;  %v2205_v49 = vmul.f32 %v2398_v59, %v3751_v30 }
 0x4b2   :  { %v2400_v41 = vsel %vm2098_vm13, 1.0, %v4189_v38  ;;  %v2070_v32 = vpop.permute.xlu1 %2069 }
 0x4b3   :  { %v2428_v25 = vpack.i.bf16 %v2400_v41, %v2399_v21  ;;  %v2086_v54 = vmul.f32 %v2070_v32, %v1982_v55  ;;  %v2207_v55 = vmul.f32 %v2400_v41, %v3753_v24  ;;  %v4242_v41 = vld [vmem:[#allocation47_spill] sm:$0xff] }
 0x4b4   :  { %v2008_v17 = vpop.xlane.xlu0 %2007 }
 0x4b5   :  { %vm2100_vm15 = vcmp.gt.f32.partialorder %v2092_v40, %v2008_v17  ;;  %2429 = vperm.xlu1 %2427, %v2428_v25   ;;  %v2094_v3 = vadd.f32 1.0, %v2086_v54 }
 0x4b6   :  { %v2402_v57 = vsel %vm2100_vm15, 1.0, %v4189_v38 }
 0x4b7   :  { %v2433_v36 = vpack.i.bf16 %v2402_v57, %v2401_v51  ;;  %v4241_v51 = vld [vmem:[#allocation46_spill] sm:$0xff] }
 0x4b8   :  { %v2014_v5 = vpop.xlane.xlu0 %2013 }
 0x4b9   :  { %2434 = vperm.xlu1 %2427, %v2433_v36   ;;  %vm2102_vm0 = vcmp.gt.f32.partialorder %v2094_v3, %v2014_v5  ;;  %v4243_v5 = vld [vmem:[#allocation45_spill] sm:$0xff] }
 0x4ba   :  { %v2404_v40 = vsel %vm2102_vm0, 1.0, %v4189_v38 }
 0x4bb   :  { %v2211_v3 = vmul.f32 %v2404_v40, %v2070_v32 }
 0x4bd   :  { %2221 = vperm.xlu1 %2427, %v2204_v56  }
 0x4be   :  { %v2063_v58 = vpop.permute.xlu0 %2062 }
 0x4bf   :  { %v2085_v34 = vmul.f32 %v2063_v58, %v1979_v60 }
 0x4c1   :  { %v2093_v50 = vadd.f32 1.0, %v2085_v34  ;;  %2227 = vperm.xlu1 %2427, %v2206_v22   ;;  %v2209_v34 = vmul.f32 %v2402_v57, %v3755_v23 }
 0x4c3   :  { %vm2101_vm1 = vcmp.gt.f32.partialorder %v2093_v50, %v2011_v31 }
 0x4c4   :  { %v2403_v39 = vsel %vm2101_vm1, 1.0, %v4189_v38 }
 0x4c5   :  { %v2438_v25 = vpack.i.bf16 %v2404_v40, %v2403_v39  ;;  %v2210_v45 = vmul.f32 %v2403_v39, %v2063_v58  ;;  %2233 = vperm.xlu1 %2427, %v2208_v0  }
 0x4c7   :  { %2439 = vperm.xlu0 %2421, %v2438_v25  }
 0x4c9   :  { %2239 = vperm.xlu1 %2427, %v2210_v45  }
 0x4cb   :  { %2224 = vperm.xlu0 %2421, %v2205_v49  }
 0x4cf   :  { %2230 = vperm.xlu0 %2421, %v2207_v55  }
 0x4d3   :  { %2236 = vperm.xlu0 %2421, %v2209_v34  }
 0x4d7   :  { %2242 = vperm.xlu0 %2421, %v2211_v3  }
 0x4fa   :  { %v1171_v60 = vpop.f32.mrf.mxu0  ;;  %v1242_v59 = vpop.f32.mrf.mxu1 }
 0x4fb   :  { %v1247_v27 = vadd.f32 %v1171_v60, %v4240_v29  ;;  %v1249_v23 = vadd.f32 %v1242_v59, %v4243_v5  ;;  %v4244_v60 = vlaneseq  ;;  %v4257_v5 = vld [vmem:[#allocation20_spill] sm:$0xff] }
 0x4fc   :  { %v1173_v21 = vpop.f32.mrf.mxu0  ;;  %v1244_v24 = vpop.f32.mrf.mxu1 }
 0x4fd   :  { %v2377_v17 = vmul.f32 -1.442695, %v1247_v27  ;;  %v1248_v30 = vadd.f32 %v1173_v21, %v4241_v51  ;;  %v1250_v31 = vadd.f32 %v1244_v24, %v4242_v41  ;;  %v2152_v29 = vand.u32 127, %v4244_v60  ;;  %v4253_v51 = vld [vmem:[#allocation16_spill] sm:$0xff]  ;;  %v4255_v24 = vld [vmem:[#allocation18_spill] sm:$0xff]  ;;  %v4256_v41 = vld [vmem:[#allocation19_spill] sm:$0xff] }
 0x4fe   :  { %v4265_v60 = vld [vmem:[#allocation28_spill] sm:$0xff] }
 0x4ff   :  { %2511 = vpow2.f32 %v2377_v17  ;;  %v2378_v36 = vmul.f32 -1.442695, %v1248_v30  ;;  %v2379_v57 = vmul.f32 -1.442695, %v1250_v31  ;;  %v4254_v30 = vld [vmem:[#allocation17_spill] sm:$0xff] }
 0x501   :  { %2513 = vpow2.f32 %v2378_v36 }
 0x502   :  { %2515 = vtanh.f32 %v1249_v23  ;;  %v4258_v23 = vld [vmem:[#allocation21_spill] sm:$0xff] }
 0x503   :  { %2517 = vpow2.f32 %v2379_v57 }
 0x50c   :  { %v2512_v56 = vpop.eup %2511 }
 0x50d   :  { %v1254_v32 = vadd.f32 1.0, %v2512_v56 }
 0x50e   :  { %v2514_v58 = vpop.eup %2513 }
 0x50f   :  { %2519 = vrcp.f32 %v1254_v32  ;;  %v1260_v22 = vadd.f32 1.0, %v2514_v58  ;;  %v2516_v54 = vpop.eup %2515 }
 0x510   :  { %v2518_v50 = vpop.eup %2517 }
 0x511   :  { %2521 = vrcp.f32 %v1260_v22  ;;  %v1267_v25 = vadd.f32 1.0, %v2518_v50  ;;  %v4259_v22 = vld [vmem:[#allocation22_spill] sm:$0xff] }
 0x513   :  { %2523 = vrcp.f32 %v1267_v25 }
 0x51c   :  { %v2520_v0 = vpop.eup %2519 }
 0x51d   :  { %v1271_v40 = vmul.f32 %v2520_v0, %v2516_v54  ;;  %v4260_v54 = vld [vmem:[#allocation23_spill] sm:$0xff] }
 0x51e   :  { %v2522_v39 = vpop.eup %2521 }
 0x51f   :  { %v1270_v49 = vmul.f32 %v2522_v39, %v3600_v1  ;;  %v3787_v1 = vsub.s32 %v2152_v29, %v4199_v52  ;;  %v4262_v39 = vld [vmem:[#allocation25_spill] sm:$0xff] }
 0x520   :  { %v2524_v55 = vpop.eup %2523  ;;  %v4266_v29 = vld [vmem:[#allocation29_spill] sm:$0xff] }
 0x521   :  { %v3776_v45 = vadd.f32 %v1271_v40, %v1270_v49  ;;  %v4261_v40 = vld [vmem:[#allocation24_spill] sm:$0xff] }
 0x523   :  { %2525 = vtanh.f32 %v3776_v45 }
 0x526   :  { %v2424_v21 = vpop.permute.xlu0 %2423 }
 0x530   :  { %v2526_v34 = vpop.eup %2525  ;;  %v2430_v27 = vpop.permute.xlu1 %2429 }
 0x531   :  { %v1274_v3 = vmul.f32 %v2526_v34, %v2524_v55  ;;  %v4263_v55 = vld [vmem:[#allocation26_spill] sm:$0xff]  ;;  %v4264_v34 = vld [vmem:[#allocation27_spill] sm:$0xff] }
 0x533   :  { %1340 = vmatmul.mubr.f32.vlgmr.msra.gmra.mxu0 %v1274_v3  ;;  %1411 = vmatmul.mubr.f32.vlgmr.msra.gmra.mxu1 %v1274_v3 }
 0x534   :  { %1446 = vmatpush1.msra.mxu0 %v3415_v16  ;;  %1517 = vmatpush1.msra.mxu1 %v3418_v14  ;;  %v2431_v16 = vunpack.i.l.bf16 %v2430_v27  ;;  %v2426_v14 = vunpack.i.h.bf16 %v2424_v21 }
 0x535   :  { %1447 = vmatprep.subr.mxu0 %v3421_v4  ;;  %1518 = vmatprep.subr.mxu1 %v3424_v18  ;;  %v2425_v4 = vunpack.i.l.bf16 %v2424_v21 }
 0x536   :  { %1448 = vmatpush1.msra.mxu0 %v3427_v26  ;;  %1519 = vmatpush1.msra.mxu1 %v3430_v13  ;;  %v2160_v18 = vrot.slane %v2426_v14, %v3787_v1  ;;  %v2432_v13 = vunpack.i.h.bf16 %v2430_v27  ;;  %v4268_v14 = vld [vmem:[#allocation36_spill] sm:$0xff] }
 0x537   :  { %1449 = vmatprep.subr.mxu0 %v3433_v19  ;;  %1520 = vmatprep.subr.mxu1 %v3436_v11  ;;  %v2156_v26 = vrot.slane %v2425_v4, %v3787_v1  ;;  %v2435_v19 = vpop.permute.xlu1 %2434  ;;  %v2164_v11 = vrot.slane %v2431_v16, %v3787_v1  ;;  %v4267_v16 = vld [vmem:[#allocation30_spill] sm:$0xff] }
 0x538   :  { %1450 = vmatpush1.msra.mxu0 %v3439_v10  ;;  %1521 = vmatpush1.msra.mxu1 %v3442_v7  ;;  %v2436_v7 = vunpack.i.l.bf16 %v2435_v19 }
 0x539   :  { %1451 = vmatprep.subr.mxu0 %v3445_v35  ;;  %1522 = vmatprep.subr.mxu1 %v3448_v44  ;;  %v2186_v10 = vsel %vm2185_vm2, %v2160_v18, %v2156_v26  ;;  %v2168_v35 = vrot.slane %v2432_v13, %v3787_v1  ;;  %v4269_v13 = vld [vmem:[#allocation38_spill] sm:$0xff] }
 0x53a   :  { %1452 = vmatpush1.msra.mxu0 %v3451_v62  ;;  %1523 = vmatpush1.msra.mxu1 %v3454_v2  ;;  %v2188_v62 = vsel %vm2187_vm3, %v2164_v11, %v2186_v10  ;;  %v2437_v2 = vunpack.i.h.bf16 %v2435_v19  ;;  %v4270_v10 = vld [vmem:[#allocation39_spill] sm:$0xff] }
 0x53b   :  { %1453 = vmatprep.subr.mxu0 %v3457_v9  ;;  %1524 = vmatprep.subr.mxu1 %v3460_v8  ;;  %v2222_v44 = vpop.permute.xlu1 %2221  ;;  %v2172_v9 = vrot.slane %v2436_v7, %v3787_v1  ;;  %v2190_v8 = vsel %vm2189_vm4, %v2168_v35, %v2188_v62  ;;  %v4271_v7 = vld [vmem:[#allocation37_spill] sm:$0xff]  ;;  %v4272_v35 = vld [vmem:[#allocation32_spill] sm:$0xff] }
 0x53c   :  { %1454 = vmatpush1.msra.mxu0 %v3463_v53  ;;  %1525 = vmatpush1.msra.mxu1 %v3466_v12  ;;  %v4245_v53 = vld [vmem:[#allocation13_spill] sm:$0xff]  ;;  %v4246_v12 = vld [vmem:[#allocation8_spill] sm:$0xff]  ;;  %v2247_v32 = vrot.slane %v2222_v44, %v3787_v1  ;;  %v4273_v44 = vld [vmem:[#allocation31_spill] sm:$0xff] }
 0x53d   :  { %1455 = vmatprep.subr.mxu0 %v4207_v37  ;;  %1526 = vmatprep.subr.mxu1 %v4208_v61  ;;  %v2192_v52 = vsel %vm2191_vm5, %v2172_v9, %v2190_v8  ;;  %v4251_v37 = vld [vmem:[#allocation14_spill] sm:$0xff]  ;;  %v4252_v61 = vld [vmem:[#allocation15_spill] sm:$0xff] }
 0x53e   :  { %1456 = vmatpush1.msra.mxu0 %v3475_v43  ;;  %1527 = vmatpush1.msra.mxu1 %v3478_v46  ;;  %v4248_v43 = vld [vmem:[#allocation34_spill] sm:$0xff]  ;;  %v2176_v46 = vrot.slane %v2437_v2, %v3787_v1  ;;  %v4274_v2 = vld [vmem:[#allocation40_spill] sm:$0xff] }
 0x53f   :  { %1457 = vmatprep.subr.mxu0 %v3481_v47  ;;  %1528 = vmatprep.subr.mxu1 %v3484_v48  ;;  %v4249_v47 = vld [vmem:[#allocation35_spill] sm:$0xff]  ;;  %v4250_v48 = vld [vmem:[#allocation33_spill] sm:$0xff] }
 0x540   :  { %1458 = vmatpush1.msra.mxu0 %v3487_v6  ;;  %1529 = vmatpush1.msra.mxu1 %v3490_v42  ;;  %v2228_v6 = vpop.permute.xlu1 %2227  ;;  %v4247_v42 = vld [vmem:[#allocation9_spill] sm:$0xff]  ;;  %v2194_v31 = vsel %vm2193_vm6, %v2176_v46, %v2192_v52  ;;  %v4275_v46 = vld [vmem:[#allocation42_spill] sm:$0xff] }
 0x541   :  { %1459 = vmatprep.subr.mxu0 %v3638_v63  ;;  %1530 = vmatprep.subr.mxu1 %v3641_v15  ;;  %v2255_v0 = vrot.slane %v2228_v6, %v3787_v1 }
 0x542   :  { %1460 = vmatpush1.msra.mxu0 %v3644_v20  ;;  %1531 = vmatpush1.msra.mxu1 %v3647_v28  ;;  %v2440_v17 = vpop.permute.xlu0 %2439 }
 0x543   :  { %1461 = vmatprep.subr.mxu0 %v3650_v33  ;;  %1532 = vmatprep.subr.mxu1 %v4245_v53  ;;  %v2442_v59 = vunpack.i.h.bf16 %v2440_v17  ;;  %v2441_v36 = vunpack.i.l.bf16 %v2440_v17  ;;  %v2641_v17 = vld [vmem:[#allocation2 + $0x1e8] sm:$0xff] }
 0x544   :  { %1462 = vmatpush1.msra.mxu0 %v4246_v12  ;;  %1533 = vmatpush1.msra.mxu1 %v4247_v42  ;;  %v2234_v58 = vpop.permute.xlu1 %2233 }
 0x545   :  { %1463 = vmatprep.subr.mxu0 %v4248_v43  ;;  %1534 = vmatprep.subr.mxu1 %v4249_v47  ;;  %v2184_v57 = vrot.slane %v2442_v59, %v3787_v1  ;;  %v2180_v56 = vrot.slane %v2441_v36, %v3787_v1  ;;  %v2263_v26 = vrot.slane %v2234_v58, %v3787_v1  ;;  %v2642_v59 = vld [vmem:[#allocation2 + $0x1f8] sm:$0xff] }
 0x546   :  { %1464 = vmatpush1.msra.mxu0 %v4250_v48  ;;  %1535 = vmatpush1.msra.mxu1 %v4251_v37  ;;  %v2225_v50 = vpop.permute.xlu0 %2224 }
 0x547   :  { %1465 = vmatprep.subr.mxu0 %v4252_v61  ;;  %1536 = vmatprep.subr.mxu1 %v4253_v51  ;;  %v2251_v25 = vrot.slane %v2225_v50, %v3787_v1  ;;  %v2196_v49 = vsel %vm2195_vm7, %v2180_v56, %v2194_v31  ;;  %v2712_v50 = vmov 1  }
 0x548   :  { %1466 = vmatpush1.msra.mxu0 %v4254_v30  ;;  %1537 = vmatpush1.msra.mxu1 %v4255_v24  ;;  %v2198_v3 = vsel %vm2197_vm8, %v2184_v57, %v2196_v49  ;;  %v2240_v11 = vpop.permute.xlu1 %2239 }
 0x549   :  { %1467 = vmatprep.subr.mxu0 %v4256_v41  ;;  %1538 = vmatprep.subr.mxu1 %v4257_v5  ;;  %v2276_v27 = vsel %vm2185_vm2, %v2251_v25, %v2247_v32  ;;  %v2201_v21 = vsel %vm2200_vm9, %v2198_v3, 0.0  ;;  %v2271_v6 = vrot.slane %v2240_v11, %v3787_v1  ;;  %v4277_v11 = vld [vmem:[#allocation48_spill] sm:$0xff] }
 0x54a   :  { %1468 = vmatpush1.msra.mxu0 %v4258_v23  ;;  %1539 = vmatpush1.msra.mxu1 %v4259_v22  ;;  %v2277_v4 = vsel %vm2187_vm3, %v2255_v0, %v2276_v27  ;;  %v2231_v18 = vpop.permute.xlu0 %2230 }
 0x54b   :  { %1469 = vmatprep.subr.mxu0 %v4260_v54  ;;  %1540 = vmatprep.subr.mxu1 %v4261_v40  ;;  %v2259_v19 = vrot.slane %v2231_v18, %v3787_v1 }
 0x54c   :  { %1470 = vmatpush1.msra.mxu0 %v4262_v39  ;;  %1541 = vmatpush1.msra.mxu1 %v4263_v55 }
 0x54d   :  { %1471 = vmatprep.subr.mxu0 %v4264_v34  ;;  %1542 = vmatprep.subr.mxu1 %v4265_v60  ;;  %v2278_v62 = vsel %vm2189_vm4, %v2259_v19, %v2277_v4  ;;  %v2714_v19 = vmov 3  }
 0x54e   :  { %1472 = vmatpush1.msra.mxu0 %v4266_v29  ;;  %1543 = vmatpush1.msra.mxu1 %v4267_v16  ;;  %v2279_v9 = vsel %vm2191_vm5, %v2263_v26, %v2278_v62  ;;  %v2237_v8 = vpop.permute.xlu0 %2236 }
 0x54f   :  { %1473 = vmatprep.subr.mxu0 %v4268_v14  ;;  %2202 = vadd.xlane.f32.xlu1 %v2201_v21  ;;  %v2267_v52 = vrot.slane %v2237_v8, %v3787_v1  ;;  %v4276_v21 = vld [vmem:[#allocation12_spill] sm:$0xff] }
 0x550   :  { %1544 = vmatprep.subr.mxu1 %v4269_v13  ;;  %1474 = vmatpush1.msra.mxu0 %v4270_v10 }
 0x551   :  { %1545 = vmatpush1.msra.mxu1 %v4271_v7  ;;  %1475 = vmatprep.subr.mxu0 %v4272_v35  ;;  %v2280_v36 = vsel %vm2193_vm6, %v2267_v52, %v2279_v9 }
 0x552   :  { %1546 = vmatprep.subr.mxu1 %v4273_v44  ;;  %1476 = vmatpush1.msra.mxu0 %v4274_v2  ;;  %v2243_v31 = vpop.permute.xlu0 %2242  ;;  %v2281_v57 = vsel %vm2195_vm7, %v2271_v6, %v2280_v36  ;;  %v4278_v6 = vld [vmem:[#allocation50_spill] sm:$0xff] }
 0x553   :  { %1509 = vmatprep.mubr.f32.mxu0 %v4189_v38  ;;  %1547 = vmatpush1.msra.mxu1 %v4275_v46  ;;  %v2275_v56 = vrot.slane %v2243_v31, %v3787_v1  ;;  %v2713_v1 = vmov 2   ;;  %v4279_v31 = vld [vmem:[#allocation51_spill] sm:$0xff] }
 0x554   :  { %1580 = vmatprep.mubr.f32.mxu1 %v4189_v38  ;;  %1615 = vmatprep.subr.mxu0 %v2641_v17 }
 0x555   :  { %1686 = vmatprep.subr.mxu1 %v2642_v59  ;;  %v2282_v32 = vsel %vm2197_vm8, %v2275_v56, %v2281_v57  ;;  %2443 = vset.pattern.permute.xlu1 %v2712_v50  ;;  %v4280_v56 = vld [vmem:[#allocation49_spill] sm:$0xff] }
 0x556   :  { %v2284_v58 = vsel %vm2200_vm9, %v2282_v32, 0.0 }
 0x557   :  { %2285 = vadd.xlane.f32.xlu0 %v2284_v58 }
 0x5d8   :  { %v2203_v0 = vpop.xlane.xlu1 %2202 }
 0x5d9   :  { %2527 = vrcp.f32 %v2203_v0 }
 0x5e0   :  { %v2286_v25 = vpop.xlane.xlu0 %2285 }
 0x5e1   :  { %v2405_v3 = vadd.f32 -1.0, %v2286_v25 }
 0x5e6   :  { %v2528_v49 = vpop.eup %2527 }
 0x5e7   :  { %v2289_v27 = vmul.f32 %v2528_v49, %v2405_v3 }
 0x5e9   :  { %v2290_v4 = vsub.f32 %v4276_v21, %v2289_v27 }
 0x5eb   :  { %v2291_v18 = vmax.f32 %v2290_v4, 0.0 }
 0x5ed   :  { %2303 = vperm.xlu1 %2443, %v2291_v18   ;;  %2295 = vperm.xlu0 %2421, %v2291_v18  }
 0x5f1   :  { %2444 = vset.pattern.permute.xlu1 %v2713_v1  ;;  %2445 = vset.pattern.permute.xlu0 %v2714_v19 }
 0x5f2   :  { %2311 = vperm.xlu1 %2444, %v2291_v18   ;;  %2319 = vperm.xlu0 %2445, %v2291_v18  }
 0x5f3   :  { %v1341_v26 = vpop.f32.mrf.mxu0  ;;  %v1412_v17 = vpop.f32.mrf.mxu1 }
 0x5f4   :  { %v1417_v62 = vadd.f32 %v1341_v26, %v4277_v11  ;;  %v1419_v32 = vadd.f32 %v1412_v17, %v4280_v56  ;;  %v2646_v17 = vld [vmem:[#allocation2 + $0x1d8] sm:$0xff]  ;;  %v2652_v56 = vld [vmem:[#allocation2 + $0x1b0] sm:$0xff] }
 0x5f5   :  { %v1343_v9 = vpop.f32.mrf.mxu0  ;;  %v1414_v36 = vpop.f32.mrf.mxu1 }
 0x5f6   :  { %v2380_v8 = vmul.f32 -1.442695, %v1417_v62  ;;  %v1418_v52 = vadd.f32 %v1343_v9, %v4278_v6  ;;  %v1420_v57 = vadd.f32 %v1414_v36, %v4279_v31  ;;  %v2644_v6 = vld [vmem:[#allocation2 + $0x1f0] sm:$0xff]  ;;  %v2649_v36 = vld [vmem:[#allocation2 + $0x1a8] sm:$0xff]  ;;  %v2650_v31 = vld [vmem:[#allocation2 + $0x1b8] sm:$0xff] }
 0x5f8   :  { %2529 = vpow2.f32 %v2380_v8  ;;  %v2381_v59 = vmul.f32 -1.442695, %v1418_v52  ;;  %v2382_v58 = vmul.f32 -1.442695, %v1420_v57  ;;  %v2643_v8 = vld [vmem:[#allocation2 + $0x1e0] sm:$0xff]  ;;  %v2645_v52 = vld [vmem:[#allocation2 + $0x1c8] sm:$0xff] }
 0x5f9   :  { %v2651_v57 = vld [vmem:[#allocation2 + $0x1a0] sm:$0xff] }
 0x5fa   :  { %2531 = vpow2.f32 %v2381_v59  ;;  %v2647_v59 = vld [vmem:[#allocation2 + $0x1c0] sm:$0xff] }
 0x5fb   :  { %2533 = vtanh.f32 %v1419_v32  ;;  %v2653_v32 = vld [vmem:[#allocation2 + $0x188] sm:$0xff] }
 0x5fc   :  { %2535 = vpow2.f32 %v2382_v58  ;;  %v2654_v58 = vld [vmem:[#allocation2 + $0x198] sm:$0xff] }
 0x605   :  { %v2530_v50 = vpop.eup %2529 }
 0x606   :  { %v1424_v0 = vadd.f32 1.0, %v2530_v50  ;;  %v2655_v50 = vld [vmem:[#allocation2 + $0x180] sm:$0xff] }
 0x607   :  { %v2532_v25 = vpop.eup %2531 }
 0x608   :  { %2537 = vrcp.f32 %v1424_v0  ;;  %v1430_v49 = vadd.f32 1.0, %v2532_v25  ;;  %v2534_v3 = vpop.eup %2533  ;;  %v2656_v0 = vld [vmem:[#allocation2 + $0x190] sm:$0xff]  ;;  %v2657_v25 = vld [vmem:[#allocation2 + $0x168] sm:$0xff] }
 0x609   :  { %v2536_v27 = vpop.eup %2535 }
 0x60a   :  { %2539 = vrcp.f32 %v1430_v49  ;;  %v1437_v26 = vadd.f32 1.0, %v2536_v27  ;;  %v2658_v49 = vld [vmem:[#allocation2 + $0x178] sm:$0xff]  ;;  %v2660_v27 = vld [vmem:[#allocation2 + $0x170] sm:$0xff] }
 0x60c   :  { %2541 = vrcp.f32 %v1437_v26  ;;  %v2664_v26 = vld [vmem:[#allocation2 + $0x150] sm:$0xff] }
 0x615   :  { %v2538_v21 = vpop.eup %2537 }
 0x616   :  { %v1441_v4 = vmul.f32 %v2538_v21, %v2534_v3  ;;  %v2659_v3 = vld [vmem:[#allocation2 + $0x160] sm:$0xff]  ;;  %v2661_v21 = vld [vmem:[#allocation2 + $0x148] sm:$0xff] }
 0x617   :  { %v2540_v18 = vpop.eup %2539 }
 0x618   :  { %v1440_v1 = vmul.f32 %v2540_v18, %v3776_v45  ;;  %v2648_v45 = vld [vmem:[#allocation2 + $0x1d0] sm:$0xff]  ;;  %v2663_v18 = vld [vmem:[#allocation2 + $0x140] sm:$0xff] }
 0x619   :  { %v2542_v11 = vpop.eup %2541 }
 0x61a   :  { %v3885_v19 = vadd.f32 %v1441_v4, %v1440_v1  ;;  %v2662_v4 = vld [vmem:[#allocation2 + $0x158] sm:$0xff]  ;;  %v2665_v1 = vld [vmem:[#allocation2 + $0x128] sm:$0xff] }
 0x61c   :  { %2543 = vtanh.f32 %v3885_v19 }
 0x629   :  { %v2544_v62 = vpop.eup %2543 }
 0x62a   :  { %v1444_v9 = vmul.f32 %v2544_v62, %v2542_v11  ;;  %v2666_v11 = vld [vmem:[#allocation2 + $0x138] sm:$0xff]  ;;  %v2667_v62 = vld [vmem:[#allocation2 + $0x120] sm:$0xff] }
 0x62c   :  { %1510 = vmatmul.mubr.f32.vlgmr.msra.gmra.mxu0 %v1444_v9  ;;  %1581 = vmatmul.mubr.f32.vlgmr.msra.gmra.mxu1 %v1444_v9  ;;  %v2668_v9 = vld [vmem:[#allocation2 + $0x130] sm:$0xff] }
 0x62d   :  { %1616 = vmatpush1.msra.mxu0 %v2643_v8  ;;  %1687 = vmatpush1.msra.mxu1 %v2644_v6 }
 0x62e   :  { %1617 = vmatprep.subr.mxu0 %v2645_v52  ;;  %1688 = vmatprep.subr.mxu1 %v2646_v17  ;;  %v4287_v52 = vld [vmem:[#allocation59_spill] sm:$0xff] }
 0x62f   :  { %1618 = vmatpush1.msra.mxu0 %v2647_v59  ;;  %1689 = vmatpush1.msra.mxu1 %v2648_v45  ;;  %v4288_v59 = vld [vmem:[#allocation57_spill] sm:$0xff] }
 0x630   :  { %1619 = vmatprep.subr.mxu0 %v2649_v36  ;;  %1690 = vmatprep.subr.mxu1 %v2650_v31 }
 0x631   :  { %1620 = vmatpush1.msra.mxu0 %v2651_v57  ;;  %1691 = vmatpush1.msra.mxu1 %v2652_v56 }
 0x632   :  { %1621 = vmatprep.subr.mxu0 %v2653_v32  ;;  %1692 = vmatprep.subr.mxu1 %v2654_v58 }
 0x633   :  { %1622 = vmatpush1.msra.mxu0 %v2655_v50  ;;  %1693 = vmatpush1.msra.mxu1 %v2656_v0 }
 0x634   :  { %1623 = vmatprep.subr.mxu0 %v2657_v25  ;;  %1694 = vmatprep.subr.mxu1 %v2658_v49 }
 0x635   :  { %1624 = vmatpush1.msra.mxu0 %v2659_v3  ;;  %1695 = vmatpush1.msra.mxu1 %v2660_v27 }
 0x636   :  { %1625 = vmatprep.subr.mxu0 %v2661_v21  ;;  %1696 = vmatprep.subr.mxu1 %v2662_v4  ;;  %v2406_v4 = vld [vmem:[%s3963_s7 + $0x8] sm:$0xff] }
 0x637   :  { %1626 = vmatpush1.msra.mxu0 %v2663_v18  ;;  %1697 = vmatpush1.msra.mxu1 %v2664_v26  ;;  %v2292_v18 = vld [vmem:[%s3963_s7] sm:$0xff] }
 0x638   :  { %1627 = vmatprep.subr.mxu0 %v2665_v1  ;;  %1698 = vmatprep.subr.mxu1 %v2666_v11 }
 0x639   :  { %1628 = vmatpush1.msra.mxu0 %v2667_v62  ;;  %1699 = vmatpush1.msra.mxu1 %v2668_v9  ;;  %v2407_v9 = vld [vmem:[%s3963_s7 + $0x10] sm:$0xff] }
 0x63a   :  { %1629 = vmatprep.subr.mxu0 %v3638_v63  ;;  %1700 = vmatprep.subr.mxu1 %v3641_v15  ;;  %v4281_v15 = vld [vmem:[#allocation52_spill] sm:$0xff] }
 0x63b   :  { %1630 = vmatpush1.msra.mxu0 %v3644_v20  ;;  %1701 = vmatpush1.msra.mxu1 %v3647_v28 }
 0x63c   :  { %1631 = vmatprep.subr.mxu0 %v3650_v33  ;;  %1702 = vmatprep.subr.mxu1 %v4245_v53  ;;  %v4282_v53 = vld [vmem:[#allocation54_spill] sm:$0xff] }
 0x63d   :  { %1632 = vmatpush1.msra.mxu0 %v4246_v12  ;;  %1703 = vmatpush1.msra.mxu1 %v4247_v42 }
 0x63e   :  { %1633 = vmatprep.subr.mxu0 %v4248_v43  ;;  %1704 = vmatprep.subr.mxu1 %v4249_v47 }
 0x63f   :  { %1634 = vmatpush1.msra.mxu0 %v4250_v48  ;;  %1705 = vmatpush1.msra.mxu1 %v4251_v37  ;;  %v4283_v48 = vld [vmem:[#allocation55_spill] sm:$0xff] }
 0x640   :  { %1635 = vmatprep.subr.mxu0 %v4252_v61  ;;  %1706 = vmatprep.subr.mxu1 %v4253_v51  ;;  %v4284_v61 = vld [vmem:[#allocation53_spill] sm:$0xff] }
 0x641   :  { %1636 = vmatpush1.msra.mxu0 %v4254_v30  ;;  %1707 = vmatpush1.msra.mxu1 %v4255_v24 }
 0x642   :  { %1637 = vmatprep.subr.mxu0 %v4256_v41  ;;  %1708 = vmatprep.subr.mxu1 %v4257_v5 }
 0x643   :  { %1638 = vmatpush1.msra.mxu0 %v4258_v23  ;;  %1709 = vmatpush1.msra.mxu1 %v4259_v22 }
 0x644   :  { %1639 = vmatprep.subr.mxu0 %v4260_v54  ;;  %1710 = vmatprep.subr.mxu1 %v4261_v40 }
 0x645   :  { %1640 = vmatpush1.msra.mxu0 %v4262_v39  ;;  %1711 = vmatpush1.msra.mxu1 %v4263_v55 }
 0x646   :  { %1641 = vmatprep.subr.mxu0 %v4264_v34  ;;  %1712 = vmatprep.subr.mxu1 %v4265_v60 }
 0x647   :  { %1642 = vmatpush1.msra.mxu0 %v4266_v29  ;;  %1713 = vmatpush1.msra.mxu1 %v4267_v16 }
 0x648   :  { %1643 = vmatprep.subr.mxu0 %v4268_v14  ;;  %1714 = vmatprep.subr.mxu1 %v4269_v13 }
 0x649   :  { %1644 = vmatpush1.msra.mxu0 %v4270_v10  ;;  %1715 = vmatpush1.msra.mxu1 %v4271_v7  ;;  %v4285_v10 = vld [vmem:[#allocation56_spill] sm:$0xff] }
 0x64a   :  { %1645 = vmatprep.subr.mxu0 %v4272_v35  ;;  %1716 = vmatprep.subr.mxu1 %v4273_v44 }
 0x64b   :  { %1646 = vmatpush1.msra.mxu0 %v4274_v2  ;;  %1679 = vmatprep.mubr.f32.mxu0 %v4189_v38  ;;  %v4286_v2 = vld [vmem:[#allocation58_spill] sm:$0xff] }
 0x64c   :  { %1717 = vmatpush1.msra.mxu1 %v4275_v46  ;;  %1750 = vmatprep.mubr.f32.mxu1 %v4189_v38 }
 0x668   :  { %v2304_v3 = vpop.permute.xlu1 %2303  ;;  %v2296_v26 = vpop.permute.xlu0 %2295 }
 0x669   :  { %v2306_v11 = vmul.f32 %v2406_v4, %v2304_v3  ;;  %v2298_v62 = vmul.f32 %v2296_v26, %v2292_v18 }
 0x6ec   :  { %v1511_v63 = vpop.f32.mrf.mxu0  ;;  %v1582_v42 = vpop.f32.mrf.mxu1 }
 0x6ed   :  { %v1587_v20 = vadd.f32 %v1511_v63, %v4281_v15  ;;  %v1589_v51 = vadd.f32 %v1582_v42, %v4284_v61  ;;  %v2312_v63 = vpop.permute.xlu1 %2311  ;;  %v2307_v15 = vadd.f32 %v2306_v11, %v2298_v62 }
 0x6ee   :  { %v1513_v28 = vpop.f32.mrf.mxu0  ;;  %v1584_v47 = vpop.f32.mrf.mxu1 }
 0x6ef   :  { %v2383_v33 = vmul.f32 -1.442695, %v1587_v20  ;;  %v1588_v12 = vadd.f32 %v1513_v28, %v4282_v53  ;;  %v1590_v37 = vadd.f32 %v1584_v47, %v4283_v48  ;;  %v2314_v20 = vmul.f32 %v2407_v9, %v2312_v63  ;;  %v2408_v28 = vld [vmem:[%s3963_s7 + $0x18] sm:$0xff] }
 0x6f0   :  { %v2325_v48 = vstv %s2324_s23 }
 0x6f1   :  { %2545 = vpow2.f32 %v2383_v33  ;;  %v2384_v43 = vmul.f32 -1.442695, %v1588_v12  ;;  %v2385_v30 = vmul.f32 -1.442695, %v1590_v37  ;;  %v2320_v33 = vpop.permute.xlu0 %2319  ;;  %v2315_v53 = vadd.f32 %v2314_v20, %v2307_v15 }
 0x6f2   :  { %v2322_v12 = vmul.f32 %v2408_v28, %v2320_v33  ;;  %v2328_v37 = vstv %s2409_s26 }
 0x6f3   :  { %2547 = vpow2.f32 %v2384_v43 }
 0x6f4   :  { %2549 = vtanh.f32 %v1589_v51  ;;  %v2323_v43 = vadd.f32 %v2322_v12, %v2315_v53 }
 0x6f5   :  { %2551 = vpow2.f32 %v2385_v30 }
 0x6f6   :  { %v2326_v51 = vmul.f32 %v2325_v48, %v2323_v43 }
 0x6fe   :  { %v2546_v24 = vpop.eup %2545 }
 0x6ff   :  { %v1594_v41 = vadd.f32 1.0, %v2546_v24  ;;  %v2332_v24 = vstv %s2410_s27 }
 0x700   :  { %v2548_v38 = vpop.eup %2547 }
 0x701   :  { %2553 = vrcp.f32 %v1594_v41  ;;  %v1600_v5 = vadd.f32 1.0, %v2548_v38  ;;  %v2550_v23 = vpop.eup %2549 }
 0x702   :  { %v2552_v22 = vpop.eup %2551 }
 0x703   :  { %2555 = vrcp.f32 %v1600_v5  ;;  %v1607_v55 = vadd.f32 1.0, %v2552_v22 }
 0x705   :  { %2557 = vrcp.f32 %v1607_v55 }
 0x70e   :  { %v2554_v54 = vpop.eup %2553 }
 0x70f   :  { %v1611_v40 = vmul.f32 %v2554_v54, %v2550_v23 }
 0x710   :  { %v2556_v39 = vpop.eup %2555 }
 0x711   :  { %v1610_v34 = vmul.f32 %v2556_v39, %v3885_v19 }
 0x712   :  { %v2558_v29 = vpop.eup %2557 }
 0x713   :  { %v1612_v60 = vadd.f32 %v1611_v40, %v1610_v34 }
 0x715   :  { %2559 = vtanh.f32 %v1612_v60 }
 0x722   :  { %v2560_v16 = vpop.eup %2559 }
 0x723   :  { %v1614_v14 = vmul.f32 %v2560_v16, %v2558_v29 }
 0x725   :  { %1680 = vmatmul.mubr.f32.vlgmr.msra.gmra.mxu0 %v1614_v14  ;;  %1751 = vmatmul.mubr.f32.vlgmr.msra.gmra.mxu1 %v1614_v14 }
 0x7e5   :  { %v1681_v13 = vpop.f32.mrf.mxu0  ;;  %v1752_v8 = vpop.f32.mrf.mxu1 }
 0x7e6   :  { %v1757_v7 = vadd.f32 %v1681_v13, %v4285_v10  ;;  %v1759_v45 = vadd.f32 %v1752_v8, %v4288_v59 }
 0x7e7   :  { %v1683_v35 = vpop.f32.mrf.mxu0  ;;  %v1754_v19 = vpop.f32.mrf.mxu1 }
 0x7e8   :  { %v2386_v44 = vmul.f32 -1.442695, %v1757_v7  ;;  %v1758_v46 = vadd.f32 %v1683_v35, %v4286_v2  ;;  %v1760_v17 = vadd.f32 %v1754_v19, %v4287_v52 }
 0x7ea   :  { %2561 = vpow2.f32 %v2386_v44  ;;  %v2387_v6 = vmul.f32 -1.442695, %v1758_v46  ;;  %v2388_v36 = vmul.f32 -1.442695, %v1760_v17 }
 0x7ec   :  { %2563 = vpow2.f32 %v2387_v6 }
 0x7ed   :  { %2565 = vtanh.f32 %v1759_v45 }
 0x7ee   :  { %2567 = vpow2.f32 %v2388_v36 }
 0x7f7   :  { %v2562_v31 = vpop.eup %2561 }
 0x7f8   :  { %v1764_v57 = vadd.f32 1.0, %v2562_v31 }
 0x7f9   :  { %v2564_v56 = vpop.eup %2563 }
 0x7fa   :  { %2569 = vrcp.f32 %v1764_v57  ;;  %v1770_v32 = vadd.f32 1.0, %v2564_v56  ;;  %v2566_v58 = vpop.eup %2565 }
 0x7fb   :  { %v2568_v50 = vpop.eup %2567 }
 0x7fc   :  { %2571 = vrcp.f32 %v1770_v32  ;;  %v1777_v27 = vadd.f32 1.0, %v2568_v50 }
 0x7fe   :  { %2573 = vrcp.f32 %v1777_v27 }
 0x807   :  { %v2570_v0 = vpop.eup %2569 }
 0x808   :  { %v1781_v25 = vmul.f32 %v2570_v0, %v2566_v58 }
 0x809   :  { %v2572_v49 = vpop.eup %2571 }
 0x80a   :  { %v1780_v21 = vmul.f32 %v2572_v49, %v1612_v60 }
 0x80b   :  { %v2574_v42 = vpop.eup %2573 }
 0x80c   :  { %v1782_v1 = vadd.f32 %v1781_v25, %v1780_v21 }
 0x80e   :  { %2575 = vtanh.f32 %v1782_v1  ;;  %1786 = vst [vmem:[%s3966_s10] sm:$0xff] %v1782_v1 }
 0x81b   :  { %v2576_v47 = vpop.eup %2575 }
 0x81c   :  { %v1784_v61 = vmul.f32 %v2576_v47, %v2574_v42 }
 0x81e   :  { %1785 = vst [vmem:[%s3965_s9] sm:$0xff] %v1784_v61  ;;  %v2329_v30 = vmul.f32 %v2328_v37, %v1784_v61 }
 0x820   :  { %v2330_v41 = vadd.f32 %v2329_v30, %v2326_v51 }
 0x822   :  { %v2333_v38 = vadd.f32 %v2332_v24, %v2330_v41 }
 0x824   :  { %2334 = vst [vmem:[%s3967_s11] sm:$0xff] %v2333_v38 }
 0x825   :  { %2347 = vsyncpa [#allocation3], 1 }
 0x826   :  { %2348 = vsyncpa [#allocation4], 1 }

</bundles_post_ra>
